<compile_context>
chip_gen: v6e
topology: v6e:2x2x1
jax: 0.10.0
libtpu: 0.0.40
codegen_flags: <defaults>
</compile_context>

<pallas_src>
import functools
import math

import jax
import jax.numpy as jnp
from jax.experimental import pallas as pl
from jax.experimental.pallas import tpu as pltpu


def _round_up(n, m):
    return ((n + m - 1) // m) * m


# -----------------------------------------------------------------------------
# Fused encoder kernel: stacked bi-LSTM recurrence + VAE head, single invocation
# -----------------------------------------------------------------------------
def _encoder_kernel(x_ref, p_ref, noise_ref, z_ref, head_ref, *, T, BP, H, Z, K):
    """Shapes (BP = batch padded to 8, K = round_up(input_size+1, 8)):
      x_ref     : (T*2BP, 2K)  row-stacked [fwd | bwd(time-reversed)] input,
                               ones column at lane I (per direction) folds the bias
      p_ref     : (ROWS, 4H)   packed params:
                               rows [0:2K)        stacked input weights + bias rows
                               rows [2K:2K+2H)    stacked W_hh^T (fwd; bwd)
                               rows [2K+2H:2K+4H) [w_mu^T | w_sig^T]  (cols 0:2Z)
                               row  2K+4H         [b_mu | b_sig]      (cols 0:2Z)
      noise_ref : (BP, Z)      reparameterization noise
      z_ref     : (BP, Z)      z = mu + exp(sig_hat/2) * noise
      head_ref  : (BP, 2Z)     [mu | sig_hat]
    """
    G = 4 * H
    B2 = 2 * BP
    R0 = 2 * K              # start of stacked W_hh^T
    R1 = R0 + 2 * H         # start of head weight
    R2 = R1 + 2 * H         # head bias row

    # Static, aligned views of the single packed parameter buffer (1 DMA).
    w_in = p_ref[0:R0, 0:G]                 # (2K, 4H)
    whh = p_ref[R0:R1, 0:G]                 # (2H, 4H) = [W_hh_f^T ; W_hh_b^T]
    w_head = p_ref[R1:R2, 0:2 * Z]          # (2H, 2Z) = [w_mu^T | w_sig^T]
    b_head = p_ref[R2:R2 + 1, 0:2 * Z]      # (1, 2Z)

    # Hoisted input projection for both directions / all time steps in ONE
    # MXU matmul; bias is folded in via the ones column of x. Off the serial path.
    g_all = jnp.dot(x_ref[...], w_in, preferred_element_type=jnp.float32)  # (T*2BP, 4H)

    # Single-pass bf16 MXU operand for the serial recurrent matmul.
    whh_bf = whh.astype(jnp.bfloat16)

    # Mask that turns the (2BP, H) state into the block form [h_f | 0 ; 0 | h_b]
    # expected by the stacked (2H, 4H) recurrent weight.
    row = jax.lax.broadcasted_iota(jnp.int32, (B2, 2 * H), 0)
    col = jax.lax.broadcasted_iota(jnp.int32, (B2, 2 * H), 1)
    blk_mask = ((row < BP) == (col < H)).astype(jnp.float32)

    h = jnp.zeros((B2, H), jnp.float32)
    c = jnp.zeros((B2, H), jnp.float32)

    # Fully unrolled recurrence (T is a small compile-time constant).
    # TODO(synk): switch to lax.fori_loop(..., unroll=8) once T grows beyond ~32.
    for t in range(T):
        g_t = g_all[t * B2:(t + 1) * B2, :]                       # aligned (2BP, 4H)
        h2 = (jnp.concatenate([h, h], axis=1) * blk_mask).astype(jnp.bfloat16)
        gates = g_t + jnp.dot(h2, whh_bf, preferred_element_type=jnp.float32)
        # Gate layout (i, f, o, g): ONE sigmoid over 3H lanes, ONE tanh over H lanes.
        s = jax.nn.sigmoid(gates[:, 0:3 * H])
        g_gate = jnp.tanh(gates[:, 3 * H:4 * H])
        c = s[:, H:2 * H] * c + s[:, 0:H] * g_gate                # f*c + i*g
        h = s[:, 2 * H:3 * H] * jnp.tanh(c)                       # o*tanh(c)

    # VAE head: [h_f | h_b] @ [w_mu^T | w_sig^T] + b  ->  (BP, 2Z)
    h_cat = jnp.concatenate([h[0:BP], h[BP:B2]], axis=1)
    head = jnp.dot(h_cat, w_head, preferred_element_type=jnp.float32) + b_head
    mu = head[:, 0:Z]
    sig_hat = head[:, Z:2 * Z]
    z_ref[...] = mu + jnp.exp(sig_hat * 0.5) * noise_ref[...]
    head_ref[...] = head


@jax.jit
def encoder_forward(packed, x, noise):
    """x: (T, B, I); noise: (B, Z). Returns (z, mu, sig_hat), each (B, Z)."""
    T, B, I = x.shape
    Z = noise.shape[1]
    G = packed.shape[1]
    H = G // 4
    K = _round_up(I + 1, 8)
    BP = _round_up(B, 8)

    # Batch-pad to the sublane granule; append the ones column that folds the
    # LSTM bias into the input-projection matmul; pad the contraction dim to K.
    ones = jnp.ones((T, B, 1), jnp.float32)
    x_aug = jnp.concatenate([x.astype(jnp.float32), ones], axis=-1)       # (T, B, I+1)
    x_aug = jnp.pad(x_aug, ((0, 0), (0, BP - B), (0, K - (I + 1))))       # (T, BP, K)
    zeros = jnp.zeros_like(x_aug)
    # Stacked fwd/bwd layout: rows [0:BP) drive the fwd weights (lanes [0:K)),
    # rows [BP:2BP) drive the bwd weights (lanes [K:2K)) with time reversed.
    x_stk = jnp.concatenate(
        [jnp.concatenate([x_aug, zeros], axis=-1),
         jnp.concatenate([zeros, x_aug[::-1]], axis=-1)], axis=1)         # (T, 2BP, 2K)
    x_flat = x_stk.reshape(T * 2 * BP, 2 * K)
    noise_p = jnp.pad(noise.astype(jnp.float32), ((0, BP - B), (0, 0)))

    vmem = pl.BlockSpec(memory_space=pltpu.MemorySpace.VMEM)
    z_p, head_p = pl.pallas_call(
        functools.partial(_encoder_kernel, T=T, BP=BP, H=H, Z=Z, K=K),
        out_shape=(jax.ShapeDtypeStruct((BP, Z), jnp.float32),
                   jax.ShapeDtypeStruct((BP, 2 * Z), jnp.float32)),
        in_specs=[vmem, vmem, vmem],
        out_specs=(vmem, vmem),
    )(x_flat, packed, noise_p)
    return z_p[:B], head_p[:B, :Z], head_p[:B, Z:]


# -----------------------------------------------------------------------------
# Parameter construction: PyTorch-style uniform init, packed into ONE buffer
# in the fused (gate-reordered, direction-stacked) layout the kernel expects.
# Also returns the raw PyTorch-layout tensors for the independent reference.
# -----------------------------------------------------------------------------
def init_params(key, input_size, h_size, z_size):
    I, H, Z = input_size, h_size, z_size
    assert 2 * Z <= 4 * H, "packed layout assumes 2*z_size <= 4*h_size"
    K = _round_up(I + 1, 8)
    G = 4 * H
    ROWS = _round_up(2 * K + 4 * H + 1, 8)

    ks = jax.random.split(key, 12)
    klstm = 1.0 / math.sqrt(H)
    klin = 1.0 / math.sqrt(2 * H)

    def u(k, shape, bound):
        return jax.random.uniform(k, shape, jnp.float32, -bound, bound)

    # PyTorch gate order (i, f, g, o) -> kernel order (i, f, o, g).
    perm = jnp.concatenate([jnp.arange(0, H), jnp.arange(H, 2 * H),
                            jnp.arange(3 * H, 4 * H), jnp.arange(2 * H, 3 * H)])

    P = jnp.zeros((ROWS, G), jnp.float32)
    raw = {}
    for d, tag in enumerate(("f", "b")):                    # fwd, bwd direction
        w_ih = u(ks[4 * d + 0], (4 * H, I), klstm)
        w_hh = u(ks[4 * d + 1], (4 * H, H), klstm)
        b_ih = u(ks[4 * d + 2], (4 * H,), klstm)
        b_hh = u(ks[4 * d + 3], (4 * H,), klstm)
        raw[f"w_ih_{tag}"] = w_ih
        raw[f"w_hh_{tag}"] = w_hh
        raw[f"b_{tag}"] = b_ih + b_hh
        r0 = d * K
        P = P.at[r0:r0 + I, :].set(w_ih[perm].T)            # (I, 4H)
        P = P.at[r0 + I, :].set((b_ih + b_hh)[perm])        # bias row (ones col in x)
        P = P.at[2 * K + d * H:2 * K + (d + 1) * H, :].set(w_hh[perm].T)

    w_mu = u(ks[8], (Z, 2 * H), klin)
    b_mu = u(ks[9], (Z,), klin)
    w_sig = u(ks[10], (Z, 2 * H), klin)
    b_sig = u(ks[11], (Z,), klin)
    raw.update(w_mu=w_mu, b_mu=b_mu, w_sig=w_sig, b_sig=b_sig)

    r1 = 2 * K + 2 * H
    P = P.at[r1:r1 + 2 * H, 0:2 * Z].set(jnp.concatenate([w_mu.T, w_sig.T], axis=1))
    P = P.at[r1 + 2 * H, 0:2 * Z].set(jnp.concatenate([b_mu, b_sig]))
    return P, raw


# -----------------------------------------------------------------------------
# Pure-JAX f32 reference (PyTorch layout / gate order), independent of packing.
# -----------------------------------------------------------------------------
def _ref_lstm_last_hidden(x, w_ih, w_hh, b):
    B = x.shape[1]
    H = w_hh.shape[1]

    def step(carry, x_t):
        h, c = carry
        gates = x_t @ w_ih.T + h @ w_hh.T + b
        i_g = jax.nn.sigmoid(gates[:, 0 * H:1 * H])
        f_g = jax.nn.sigmoid(gates[:, 1 * H:2 * H])
        g_g = jnp.tanh(gates[:, 2 * H:3 * H])
        o_g = jax.nn.sigmoid(gates[:, 3 * H:4 * H])
        c = f_g * c + i_g * g_g
        h = o_g * jnp.tanh(c)
        return (h, c), None

    (h, _), _ = jax.lax.scan(step, (jnp.zeros((B, H)), jnp.zeros((B, H))), x)
    return h


def _ref_forward(raw, x, noise):
    h_f = _ref_lstm_last_hidden(x, raw["w_ih_f"], raw["w_hh_f"], raw["b_f"])
    h_b = _ref_lstm_last_hidden(jnp.flip(x, 0), raw["w_ih_b"], raw["w_hh_b"], raw["b_b"])
    h_cat = jnp.concatenate([h_f, h_b], axis=1)
    mu = h_cat @ raw["w_mu"].T + raw["b_mu"]
    sig_hat = h_cat @ raw["w_sig"].T + raw["b_sig"]
    z = mu + jnp.exp(sig_hat / 2.0) * noise
    return z, mu, sig_hat


if __name__ == "__main__":
    T, B, INPUT, H, Z = 8, 2, 5, 32, 16

    key = jax.random.PRNGKey(0)
    kp, kx, kn = jax.random.split(key, 3)
    packed, raw = init_params(kp, INPUT, H, Z)
    x = jax.random.normal(kx, (T, B, INPUT), jnp.float32)
    noise = jax.random.normal(kn, (B, Z), jnp.float32)   # torch.normal(0, 1) equivalent

    z, mu, sig_hat = encoder_forward(packed, x, noise)
    jax.block_until_ready((z, mu, sig_hat))

    z_r, mu_r, sig_r = _ref_forward(raw, x, noise)
    # bf16 operands on the recurrent matmul => slightly looser tolerance than pure f32.
    assert jnp.allclose(mu, mu_r, atol=2e-2, rtol=2e-2)
    assert jnp.allclose(sig_hat, sig_r, atol=2e-2, rtol=2e-2)
    assert jnp.allclose(z, z_r, atol=2e-2, rtol=2e-2)

    print("KERNEL_OK")
</pallas_src>

<mosaic_0001>
module attributes {stable_mosaic.version = 11 : i64} {
  func.func @_encoder_kernel(%arg0: memref<128x16xf32, #tpu.memory_space<vmem>>, %arg1: memref<152x128xf32, #tpu.memory_space<vmem>>, %arg2: memref<8x16xf32, #tpu.memory_space<vmem>>, %arg3: memref<8x16xf32, #tpu.memory_space<vmem>>, %arg4: memref<8x32xf32, #tpu.memory_space<vmem>>) attributes {dimension_semantics = [], scalar_prefetch = 0 : i64, scratch_operands = 0 : i64, tpu.core_type = #tpu.core_type<tc>} {
    %c0 = arith.constant 0 : index
    %c0_0 = arith.constant 0 : index
    %0 = vector.load %arg1[%c0, %c0_0] : memref<152x128xf32, #tpu.memory_space<vmem>>, vector<16x128xf32>
    %c16 = arith.constant 16 : index
    %c0_1 = arith.constant 0 : index
    %1 = vector.load %arg1[%c16, %c0_1] : memref<152x128xf32, #tpu.memory_space<vmem>>, vector<64x128xf32>
    %c80 = arith.constant 80 : index
    %c0_2 = arith.constant 0 : index
    %2 = vector.load %arg1[%c80, %c0_2] : memref<152x128xf32, #tpu.memory_space<vmem>>, vector<64x32xf32>
    %c144 = arith.constant 144 : index
    %c0_3 = arith.constant 0 : index
    %3 = vector.load %arg1[%c144, %c0_3] : memref<152x128xf32, #tpu.memory_space<vmem>>, vector<1x32xf32>
    %c0_4 = arith.constant 0 : index
    %c0_5 = arith.constant 0 : index
    %4 = vector.load %arg0[%c0_4, %c0_5] : memref<128x16xf32, #tpu.memory_space<vmem>>, vector<128x16xf32>
    %cst = arith.constant dense<0.000000e+00> : vector<128x128xf32>
    %5 = tpu.matmul %4, %0, %cst {dimension_numbers = #tpu.dot_dimension_numbers<[1], [0], [0], [1], [0, 0, 1, 1], [], []>} : vector<128x16xf32>, vector<16x128xf32>, vector<128x128xf32> -> vector<128x128xf32>
    %6 = arith.truncf %1 : vector<64x128xf32> to vector<64x128xbf16>
    %7 = tpu.iota {dimensions = array<i32: 0>} : vector<16x64xi32>
    %8 = tpu.iota {dimensions = array<i32: 1>} : vector<16x64xi32>
    %c8_i32 = arith.constant 8 : i32
    %9 = vector.broadcast %c8_i32 : i32 to vector<16x64xi32>
    %10 = arith.cmpi slt, %7, %9 : vector<16x64xi32>
    %c32_i32 = arith.constant 32 : i32
    %11 = vector.broadcast %c32_i32 : i32 to vector<16x64xi32>
    %12 = arith.cmpi slt, %8, %11 : vector<16x64xi32>
    %13 = arith.xori %10, %12 : vector<16x64xi1>
    %cst_6 = arith.constant dense<true> : vector<16x64xi1>
    %14 = arith.xori %13, %cst_6 : vector<16x64xi1>
    %15 = arith.extui %14 : vector<16x64xi1> to vector<16x64xi32>
    %16 = arith.sitofp %15 : vector<16x64xi32> to vector<16x64xf32>
    %cst_7 = arith.constant 0.000000e+00 : f32
    %17 = vector.broadcast %cst_7 : f32 to vector<16x32xf32>
    %cst_8 = arith.constant 0.000000e+00 : f32
    %18 = vector.broadcast %cst_8 : f32 to vector<16x32xf32>
    %19 = vector.extract_strided_slice %5 {offsets = [0, 0], sizes = [16, 128], strides = [1, 1]} : vector<128x128xf32> to vector<16x128xf32>
    %20 = tpu.concatenate %17, %17 in 1 : vector<16x32xf32>, vector<16x32xf32> -> vector<16x64xf32>
    %21 = arith.mulf %20, %16 : vector<16x64xf32>
    %22 = arith.truncf %21 : vector<16x64xf32> to vector<16x64xbf16>
    %cst_9 = arith.constant dense<0.000000e+00> : vector<16x128xf32>
    %23 = tpu.matmul %22, %6, %cst_9 {dimension_numbers = #tpu.dot_dimension_numbers<[1], [0], [0], [1], [0, 0, 1, 1], [], []>} : vector<16x64xbf16>, vector<64x128xbf16>, vector<16x128xf32> -> vector<16x128xf32>
    %24 = arith.addf %19, %23 : vector<16x128xf32>
    %25 = vector.extract_strided_slice %24 {offsets = [0, 0], sizes = [16, 96], strides = [1, 1]} : vector<16x128xf32> to vector<16x96xf32>
    %26 = arith.negf %25 : vector<16x96xf32>
    %27 = math.exp %26 : vector<16x96xf32>
    %cst_10 = arith.constant 1.000000e+00 : f32
    %28 = vector.broadcast %cst_10 : f32 to vector<16x96xf32>
    %29 = arith.addf %28, %27 : vector<16x96xf32>
    %30 = arith.divf %28, %29 : vector<16x96xf32>
    %31 = vector.extract_strided_slice %24 {offsets = [0, 96], sizes = [16, 32], strides = [1, 1]} : vector<16x128xf32> to vector<16x32xf32>
    %32 = math.tanh %31 : vector<16x32xf32>
    %33 = vector.extract_strided_slice %30 {offsets = [0, 32], sizes = [16, 32], strides = [1, 1]} : vector<16x96xf32> to vector<16x32xf32>
    %34 = arith.mulf %33, %18 : vector<16x32xf32>
    %35 = vector.extract_strided_slice %30 {offsets = [0, 0], sizes = [16, 32], strides = [1, 1]} : vector<16x96xf32> to vector<16x32xf32>
    %36 = arith.mulf %35, %32 : vector<16x32xf32>
    %37 = arith.addf %34, %36 : vector<16x32xf32>
    %38 = vector.extract_strided_slice %30 {offsets = [0, 64], sizes = [16, 32], strides = [1, 1]} : vector<16x96xf32> to vector<16x32xf32>
    %39 = math.tanh %37 : vector<16x32xf32>
    %40 = arith.mulf %38, %39 : vector<16x32xf32>
    %41 = vector.extract_strided_slice %5 {offsets = [16, 0], sizes = [16, 128], strides = [1, 1]} : vector<128x128xf32> to vector<16x128xf32>
    %42 = tpu.concatenate %40, %40 in 1 : vector<16x32xf32>, vector<16x32xf32> -> vector<16x64xf32>
    %43 = arith.mulf %42, %16 : vector<16x64xf32>
    %44 = arith.truncf %43 : vector<16x64xf32> to vector<16x64xbf16>
    %cst_11 = arith.constant dense<0.000000e+00> : vector<16x128xf32>
    %45 = tpu.matmul %44, %6, %cst_11 {dimension_numbers = #tpu.dot_dimension_numbers<[1], [0], [0], [1], [0, 0, 1, 1], [], []>} : vector<16x64xbf16>, vector<64x128xbf16>, vector<16x128xf32> -> vector<16x128xf32>
    %46 = arith.addf %41, %45 : vector<16x128xf32>
    %47 = vector.extract_strided_slice %46 {offsets = [0, 0], sizes = [16, 96], strides = [1, 1]} : vector<16x128xf32> to vector<16x96xf32>
    %48 = arith.negf %47 : vector<16x96xf32>
    %49 = math.exp %48 : vector<16x96xf32>
    %cst_12 = arith.constant 1.000000e+00 : f32
    %50 = vector.broadcast %cst_12 : f32 to vector<16x96xf32>
    %51 = arith.addf %50, %49 : vector<16x96xf32>
    %52 = arith.divf %50, %51 : vector<16x96xf32>
    %53 = vector.extract_strided_slice %46 {offsets = [0, 96], sizes = [16, 32], strides = [1, 1]} : vector<16x128xf32> to vector<16x32xf32>
    %54 = math.tanh %53 : vector<16x32xf32>
    %55 = vector.extract_strided_slice %52 {offsets = [0, 32], sizes = [16, 32], strides = [1, 1]} : vector<16x96xf32> to vector<16x32xf32>
    %56 = arith.mulf %55, %37 : vector<16x32xf32>
    %57 = vector.extract_strided_slice %52 {offsets = [0, 0], sizes = [16, 32], strides = [1, 1]} : vector<16x96xf32> to vector<16x32xf32>
    %58 = arith.mulf %57, %54 : vector<16x32xf32>
    %59 = arith.addf %56, %58 : vector<16x32xf32>
    %60 = vector.extract_strided_slice %52 {offsets = [0, 64], sizes = [16, 32], strides = [1, 1]} : vector<16x96xf32> to vector<16x32xf32>
    %61 = math.tanh %59 : vector<16x32xf32>
    %62 = arith.mulf %60, %61 : vector<16x32xf32>
    %63 = vector.extract_strided_slice %5 {offsets = [32, 0], sizes = [16, 128], strides = [1, 1]} : vector<128x128xf32> to vector<16x128xf32>
    %64 = tpu.concatenate %62, %62 in 1 : vector<16x32xf32>, vector<16x32xf32> -> vector<16x64xf32>
    %65 = arith.mulf %64, %16 : vector<16x64xf32>
    %66 = arith.truncf %65 : vector<16x64xf32> to vector<16x64xbf16>
    %cst_13 = arith.constant dense<0.000000e+00> : vector<16x128xf32>
    %67 = tpu.matmul %66, %6, %cst_13 {dimension_numbers = #tpu.dot_dimension_numbers<[1], [0], [0], [1], [0, 0, 1, 1], [], []>} : vector<16x64xbf16>, vector<64x128xbf16>, vector<16x128xf32> -> vector<16x128xf32>
    %68 = arith.addf %63, %67 : vector<16x128xf32>
    %69 = vector.extract_strided_slice %68 {offsets = [0, 0], sizes = [16, 96], strides = [1, 1]} : vector<16x128xf32> to vector<16x96xf32>
    %70 = arith.negf %69 : vector<16x96xf32>
    %71 = math.exp %70 : vector<16x96xf32>
    %cst_14 = arith.constant 1.000000e+00 : f32
    %72 = vector.broadcast %cst_14 : f32 to vector<16x96xf32>
    %73 = arith.addf %72, %71 : vector<16x96xf32>
    %74 = arith.divf %72, %73 : vector<16x96xf32>
    %75 = vector.extract_strided_slice %68 {offsets = [0, 96], sizes = [16, 32], strides = [1, 1]} : vector<16x128xf32> to vector<16x32xf32>
    %76 = math.tanh %75 : vector<16x32xf32>
    %77 = vector.extract_strided_slice %74 {offsets = [0, 32], sizes = [16, 32], strides = [1, 1]} : vector<16x96xf32> to vector<16x32xf32>
    %78 = arith.mulf %77, %59 : vector<16x32xf32>
    %79 = vector.extract_strided_slice %74 {offsets = [0, 0], sizes = [16, 32], strides = [1, 1]} : vector<16x96xf32> to vector<16x32xf32>
    %80 = arith.mulf %79, %76 : vector<16x32xf32>
    %81 = arith.addf %78, %80 : vector<16x32xf32>
    %82 = vector.extract_strided_slice %74 {offsets = [0, 64], sizes = [16, 32], strides = [1, 1]} : vector<16x96xf32> to vector<16x32xf32>
    %83 = math.tanh %81 : vector<16x32xf32>
    %84 = arith.mulf %82, %83 : vector<16x32xf32>
    %85 = vector.extract_strided_slice %5 {offsets = [48, 0], sizes = [16, 128], strides = [1, 1]} : vector<128x128xf32> to vector<16x128xf32>
    %86 = tpu.concatenate %84, %84 in 1 : vector<16x32xf32>, vector<16x32xf32> -> vector<16x64xf32>
    %87 = arith.mulf %86, %16 : vector<16x64xf32>
    %88 = arith.truncf %87 : vector<16x64xf32> to vector<16x64xbf16>
    %cst_15 = arith.constant dense<0.000000e+00> : vector<16x128xf32>
    %89 = tpu.matmul %88, %6, %cst_15 {dimension_numbers = #tpu.dot_dimension_numbers<[1], [0], [0], [1], [0, 0, 1, 1], [], []>} : vector<16x64xbf16>, vector<64x128xbf16>, vector<16x128xf32> -> vector<16x128xf32>
    %90 = arith.addf %85, %89 : vector<16x128xf32>
    %91 = vector.extract_strided_slice %90 {offsets = [0, 0], sizes = [16, 96], strides = [1, 1]} : vector<16x128xf32> to vector<16x96xf32>
    %92 = arith.negf %91 : vector<16x96xf32>
    %93 = math.exp %92 : vector<16x96xf32>
    %cst_16 = arith.constant 1.000000e+00 : f32
    %94 = vector.broadcast %cst_16 : f32 to vector<16x96xf32>
    %95 = arith.addf %94, %93 : vector<16x96xf32>
    %96 = arith.divf %94, %95 : vector<16x96xf32>
    %97 = vector.extract_strided_slice %90 {offsets = [0, 96], sizes = [16, 32], strides = [1, 1]} : vector<16x128xf32> to vector<16x32xf32>
    %98 = math.tanh %97 : vector<16x32xf32>
    %99 = vector.extract_strided_slice %96 {offsets = [0, 32], sizes = [16, 32], strides = [1, 1]} : vector<16x96xf32> to vector<16x32xf32>
    %100 = arith.mulf %99, %81 : vector<16x32xf32>
    %101 = vector.extract_strided_slice %96 {offsets = [0, 0], sizes = [16, 32], strides = [1, 1]} : vector<16x96xf32> to vector<16x32xf32>
    %102 = arith.mulf %101, %98 : vector<16x32xf32>
    %103 = arith.addf %100, %102 : vector<16x32xf32>
    %104 = vector.extract_strided_slice %96 {offsets = [0, 64], sizes = [16, 32], strides = [1, 1]} : vector<16x96xf32> to vector<16x32xf32>
    %105 = math.tanh %103 : vector<16x32xf32>
    %106 = arith.mulf %104, %105 : vector<16x32xf32>
    %107 = vector.extract_strided_slice %5 {offsets = [64, 0], sizes = [16, 128], strides = [1, 1]} : vector<128x128xf32> to vector<16x128xf32>
    %108 = tpu.concatenate %106, %106 in 1 : vector<16x32xf32>, vector<16x32xf32> -> vector<16x64xf32>
    %109 = arith.mulf %108, %16 : vector<16x64xf32>
    %110 = arith.truncf %109 : vector<16x64xf32> to vector<16x64xbf16>
    %cst_17 = arith.constant dense<0.000000e+00> : vector<16x128xf32>
    %111 = tpu.matmul %110, %6, %cst_17 {dimension_numbers = #tpu.dot_dimension_numbers<[1], [0], [0], [1], [0, 0, 1, 1], [], []>} : vector<16x64xbf16>, vector<64x128xbf16>, vector<16x128xf32> -> vector<16x128xf32>
    %112 = arith.addf %107, %111 : vector<16x128xf32>
    %113 = vector.extract_strided_slice %112 {offsets = [0, 0], sizes = [16, 96], strides = [1, 1]} : vector<16x128xf32> to vector<16x96xf32>
    %114 = arith.negf %113 : vector<16x96xf32>
    %115 = math.exp %114 : vector<16x96xf32>
    %cst_18 = arith.constant 1.000000e+00 : f32
    %116 = vector.broadcast %cst_18 : f32 to vector<16x96xf32>
    %117 = arith.addf %116, %115 : vector<16x96xf32>
    %118 = arith.divf %116, %117 : vector<16x96xf32>
    %119 = vector.extract_strided_slice %112 {offsets = [0, 96], sizes = [16, 32], strides = [1, 1]} : vector<16x128xf32> to vector<16x32xf32>
    %120 = math.tanh %119 : vector<16x32xf32>
    %121 = vector.extract_strided_slice %118 {offsets = [0, 32], sizes = [16, 32], strides = [1, 1]} : vector<16x96xf32> to vector<16x32xf32>
    %122 = arith.mulf %121, %103 : vector<16x32xf32>
    %123 = vector.extract_strided_slice %118 {offsets = [0, 0], sizes = [16, 32], strides = [1, 1]} : vector<16x96xf32> to vector<16x32xf32>
    %124 = arith.mulf %123, %120 : vector<16x32xf32>
    %125 = arith.addf %122, %124 : vector<16x32xf32>
    %126 = vector.extract_strided_slice %118 {offsets = [0, 64], sizes = [16, 32], strides = [1, 1]} : vector<16x96xf32> to vector<16x32xf32>
    %127 = math.tanh %125 : vector<16x32xf32>
    %128 = arith.mulf %126, %127 : vector<16x32xf32>
    %129 = vector.extract_strided_slice %5 {offsets = [80, 0], sizes = [16, 128], strides = [1, 1]} : vector<128x128xf32> to vector<16x128xf32>
    %130 = tpu.concatenate %128, %128 in 1 : vector<16x32xf32>, vector<16x32xf32> -> vector<16x64xf32>
    %131 = arith.mulf %130, %16 : vector<16x64xf32>
    %132 = arith.truncf %131 : vector<16x64xf32> to vector<16x64xbf16>
    %cst_19 = arith.constant dense<0.000000e+00> : vector<16x128xf32>
    %133 = tpu.matmul %132, %6, %cst_19 {dimension_numbers = #tpu.dot_dimension_numbers<[1], [0], [0], [1], [0, 0, 1, 1], [], []>} : vector<16x64xbf16>, vector<64x128xbf16>, vector<16x128xf32> -> vector<16x128xf32>
    %134 = arith.addf %129, %133 : vector<16x128xf32>
    %135 = vector.extract_strided_slice %134 {offsets = [0, 0], sizes = [16, 96], strides = [1, 1]} : vector<16x128xf32> to vector<16x96xf32>
    %136 = arith.negf %135 : vector<16x96xf32>
    %137 = math.exp %136 : vector<16x96xf32>
    %cst_20 = arith.constant 1.000000e+00 : f32
    %138 = vector.broadcast %cst_20 : f32 to vector<16x96xf32>
    %139 = arith.addf %138, %137 : vector<16x96xf32>
    %140 = arith.divf %138, %139 : vector<16x96xf32>
    %141 = vector.extract_strided_slice %134 {offsets = [0, 96], sizes = [16, 32], strides = [1, 1]} : vector<16x128xf32> to vector<16x32xf32>
    %142 = math.tanh %141 : vector<16x32xf32>
    %143 = vector.extract_strided_slice %140 {offsets = [0, 32], sizes = [16, 32], strides = [1, 1]} : vector<16x96xf32> to vector<16x32xf32>
    %144 = arith.mulf %143, %125 : vector<16x32xf32>
    %145 = vector.extract_strided_slice %140 {offsets = [0, 0], sizes = [16, 32], strides = [1, 1]} : vector<16x96xf32> to vector<16x32xf32>
    %146 = arith.mulf %145, %142 : vector<16x32xf32>
    %147 = arith.addf %144, %146 : vector<16x32xf32>
    %148 = vector.extract_strided_slice %140 {offsets = [0, 64], sizes = [16, 32], strides = [1, 1]} : vector<16x96xf32> to vector<16x32xf32>
    %149 = math.tanh %147 : vector<16x32xf32>
    %150 = arith.mulf %148, %149 : vector<16x32xf32>
    %151 = vector.extract_strided_slice %5 {offsets = [96, 0], sizes = [16, 128], strides = [1, 1]} : vector<128x128xf32> to vector<16x128xf32>
    %152 = tpu.concatenate %150, %150 in 1 : vector<16x32xf32>, vector<16x32xf32> -> vector<16x64xf32>
    %153 = arith.mulf %152, %16 : vector<16x64xf32>
    %154 = arith.truncf %153 : vector<16x64xf32> to vector<16x64xbf16>
    %cst_21 = arith.constant dense<0.000000e+00> : vector<16x128xf32>
    %155 = tpu.matmul %154, %6, %cst_21 {dimension_numbers = #tpu.dot_dimension_numbers<[1], [0], [0], [1], [0, 0, 1, 1], [], []>} : vector<16x64xbf16>, vector<64x128xbf16>, vector<16x128xf32> -> vector<16x128xf32>
    %156 = arith.addf %151, %155 : vector<16x128xf32>
    %157 = vector.extract_strided_slice %156 {offsets = [0, 0], sizes = [16, 96], strides = [1, 1]} : vector<16x128xf32> to vector<16x96xf32>
    %158 = arith.negf %157 : vector<16x96xf32>
    %159 = math.exp %158 : vector<16x96xf32>
    %cst_22 = arith.constant 1.000000e+00 : f32
    %160 = vector.broadcast %cst_22 : f32 to vector<16x96xf32>
    %161 = arith.addf %160, %159 : vector<16x96xf32>
    %162 = arith.divf %160, %161 : vector<16x96xf32>
    %163 = vector.extract_strided_slice %156 {offsets = [0, 96], sizes = [16, 32], strides = [1, 1]} : vector<16x128xf32> to vector<16x32xf32>
    %164 = math.tanh %163 : vector<16x32xf32>
    %165 = vector.extract_strided_slice %162 {offsets = [0, 32], sizes = [16, 32], strides = [1, 1]} : vector<16x96xf32> to vector<16x32xf32>
    %166 = arith.mulf %165, %147 : vector<16x32xf32>
    %167 = vector.extract_strided_slice %162 {offsets = [0, 0], sizes = [16, 32], strides = [1, 1]} : vector<16x96xf32> to vector<16x32xf32>
    %168 = arith.mulf %167, %164 : vector<16x32xf32>
    %169 = arith.addf %166, %168 : vector<16x32xf32>
    %170 = vector.extract_strided_slice %162 {offsets = [0, 64], sizes = [16, 32], strides = [1, 1]} : vector<16x96xf32> to vector<16x32xf32>
    %171 = math.tanh %169 : vector<16x32xf32>
    %172 = arith.mulf %170, %171 : vector<16x32xf32>
    %173 = vector.extract_strided_slice %5 {offsets = [112, 0], sizes = [16, 128], strides = [1, 1]} : vector<128x128xf32> to vector<16x128xf32>
    %174 = tpu.concatenate %172, %172 in 1 : vector<16x32xf32>, vector<16x32xf32> -> vector<16x64xf32>
    %175 = arith.mulf %174, %16 : vector<16x64xf32>
    %176 = arith.truncf %175 : vector<16x64xf32> to vector<16x64xbf16>
    %cst_23 = arith.constant dense<0.000000e+00> : vector<16x128xf32>
    %177 = tpu.matmul %176, %6, %cst_23 {dimension_numbers = #tpu.dot_dimension_numbers<[1], [0], [0], [1], [0, 0, 1, 1], [], []>} : vector<16x64xbf16>, vector<64x128xbf16>, vector<16x128xf32> -> vector<16x128xf32>
    %178 = arith.addf %173, %177 : vector<16x128xf32>
    %179 = vector.extract_strided_slice %178 {offsets = [0, 0], sizes = [16, 96], strides = [1, 1]} : vector<16x128xf32> to vector<16x96xf32>
    %180 = arith.negf %179 : vector<16x96xf32>
    %181 = math.exp %180 : vector<16x96xf32>
    %cst_24 = arith.constant 1.000000e+00 : f32
    %182 = vector.broadcast %cst_24 : f32 to vector<16x96xf32>
    %183 = arith.addf %182, %181 : vector<16x96xf32>
    %184 = arith.divf %182, %183 : vector<16x96xf32>
    %185 = vector.extract_strided_slice %178 {offsets = [0, 96], sizes = [16, 32], strides = [1, 1]} : vector<16x128xf32> to vector<16x32xf32>
    %186 = math.tanh %185 : vector<16x32xf32>
    %187 = vector.extract_strided_slice %184 {offsets = [0, 32], sizes = [16, 32], strides = [1, 1]} : vector<16x96xf32> to vector<16x32xf32>
    %188 = arith.mulf %187, %169 : vector<16x32xf32>
    %189 = vector.extract_strided_slice %184 {offsets = [0, 0], sizes = [16, 32], strides = [1, 1]} : vector<16x96xf32> to vector<16x32xf32>
    %190 = arith.mulf %189, %186 : vector<16x32xf32>
    %191 = arith.addf %188, %190 : vector<16x32xf32>
    %192 = vector.extract_strided_slice %184 {offsets = [0, 64], sizes = [16, 32], strides = [1, 1]} : vector<16x96xf32> to vector<16x32xf32>
    %193 = math.tanh %191 : vector<16x32xf32>
    %194 = arith.mulf %192, %193 : vector<16x32xf32>
    %195 = vector.extract_strided_slice %194 {offsets = [0, 0], sizes = [8, 32], strides = [1, 1]} : vector<16x32xf32> to vector<8x32xf32>
    %196 = vector.extract_strided_slice %194 {offsets = [8, 0], sizes = [8, 32], strides = [1, 1]} : vector<16x32xf32> to vector<8x32xf32>
    %197 = tpu.concatenate %195, %196 in 1 : vector<8x32xf32>, vector<8x32xf32> -> vector<8x64xf32>
    %cst_25 = arith.constant dense<0.000000e+00> : vector<8x32xf32>
    %198 = tpu.matmul %197, %2, %cst_25 {dimension_numbers = #tpu.dot_dimension_numbers<[1], [0], [0], [1], [0, 0, 1, 1], [], []>} : vector<8x64xf32>, vector<64x32xf32>, vector<8x32xf32> -> vector<8x32xf32>
    %199 = vector.broadcast %3 : vector<1x32xf32> to vector<8x32xf32>
    %200 = arith.addf %198, %199 : vector<8x32xf32>
    %201 = vector.extract_strided_slice %200 {offsets = [0, 0], sizes = [8, 16], strides = [1, 1]} : vector<8x32xf32> to vector<8x16xf32>
    %202 = vector.extract_strided_slice %200 {offsets = [0, 16], sizes = [8, 16], strides = [1, 1]} : vector<8x32xf32> to vector<8x16xf32>
    %cst_26 = arith.constant 5.000000e-01 : f32
    %203 = vector.broadcast %cst_26 : f32 to vector<8x16xf32>
    %204 = arith.mulf %202, %203 : vector<8x16xf32>
    %205 = math.exp %204 : vector<8x16xf32>
    %c0_27 = arith.constant 0 : index
    %c0_28 = arith.constant 0 : index
    %206 = vector.load %arg2[%c0_27, %c0_28] : memref<8x16xf32, #tpu.memory_space<vmem>>, vector<8x16xf32>
    %207 = arith.mulf %205, %206 : vector<8x16xf32>
    %208 = arith.addf %201, %207 : vector<8x16xf32>
    %c0_29 = arith.constant 0 : index
    %c0_30 = arith.constant 0 : index
    %209 = vector.load %arg3[%c0_29, %c0_30] : memref<8x16xf32, #tpu.memory_space<vmem>>, vector<8x16xf32>
    tpu.vector_store %arg3[%c0_29, %c0_30], %208 {strides = array<i32>} : memref<8x16xf32, #tpu.memory_space<vmem>>, vector<8x16xf32>,
    %c0_31 = arith.constant 0 : index
    %c0_32 = arith.constant 0 : index
    %210 = vector.load %arg4[%c0_31, %c0_32] : memref<8x32xf32, #tpu.memory_space<vmem>>, vector<8x32xf32>
    tpu.vector_store %arg4[%c0_31, %c0_32], %200 {strides = array<i32>} : memref<8x32xf32, #tpu.memory_space<vmem>>, vector<8x32xf32>,
    return
  }
}

</mosaic_0001>

<bundles_post_ra>
// kernel: encoder_forward.1
= control target key start
LH: loop header
LB: loop body
LE: loop exit
PB: predicated region body
PF: predicated region fallthrough
CT: control target
= control target key end

     0   :  { %v253_v0 = vlaneseq  ;;  %v1658_v1 = vmov 0.0   ;;  %vm1659_vm0 = vmmov 0   ;;  %vm52_vm1 = vcmask 130048   ;;  %s1661_s13 = smov 32   ;;  %s1662_s18 = smov 64   ;;  %s2115_s1 = inlined_call_operand.vmem [shape: f32[152,128], index: 1, kind: input, shape index: {}]   ;;  %s2116_s0 = inlined_call_operand.vmem [shape: f32[128,16], index: 0, kind: input, shape index: {}]   ;;  %s2117_s2 = inlined_call_operand.vmem [shape: f32[8,16], index: 2, kind: input, shape index: {}]   ;;  %s2118_s4 = inlined_call_operand.vmem [shape: f32[8,32], index: 4, kind: output, shape index: {1}]   ;;  %s2119_s3 = inlined_call_operand.vmem [shape: f32[8,16], index: 3, kind: output, shape index: {0}]  }
   0x1   :  { %1405 = vmatprep.subr.bf16.mxu1 %v1658_v1  ;;  %v25_v2 = vld [vmem:[%s2115_s1 + $0x40] sm:$0xff]  ;;  %v26_v3 = vld [vmem:[%s2115_s1 + $0x48] sm:$0xff]  ;;  %v23_v4 = vld [vmem:[%s2115_s1 + $0x30] sm:$0xff]  ;;  %1413 = vmatprep.mubr.msk.bf16.mxu1 %vm1659_vm0, %v1658_v1  ;;  %vm1660_vm3 = vmmov 1   ;;  %vm269_vm7 = vcmask 523264   ;;  %s1663_s19 = smov 96  }
   0x2   :  { %v1703_v5 = vpack.c.bf16 %v26_v3, %v25_v2  ;;  %v24_v6 = vld [vmem:[%s2115_s1 + $0x38] sm:$0xff]  ;;  %v18_v7 = vld [vmem:[%s2115_s1 + $0x8] sm:$0xff]  ;;  %v254_v8 = vand.u32 127, %v253_v0  ;;  %v17_v9 = vld [vmem:[%s2115_s1] sm:$0xff]  ;;  %vm378_vm8 = vcmask 261120   ;;  %s1664_s11 = smov 16  }
   0x3   :  { %1377 = vmatprep.subr.mxu0 %v18_v7  ;;  %v36_v10 = vld [vmem:[%s2116_s0] sm:$0xff]  ;;  %v1718_v11 = vpack.c.bf16 %v24_v6, %v23_v4  ;;  %v37_v12 = vld [vmem:[%s2116_s0 + $0x8] sm:$0xff]  ;;  %v19_v18 = vld [vmem:[%s2115_s1 + $0x10] sm:$0xff] }
   0x4   :  { %1406 = vmatpush3.bf16.msra.mxu1 %v1703_v5  ;;  %1378 = vmatpush3.msra.mxu0 %v18_v7  ;;  %vm257_vm2 = vcmp.lt.s32.totalorder %v254_v8, 32  ;;  %v21_v13 = vld [vmem:[%s2115_s1 + $0x20] sm:$0xff]  ;;  %v22_v14 = vld [vmem:[%s2115_s1 + $0x28] sm:$0xff]  ;;  %v20_v19 = vld [vmem:[%s2115_s1 + $0x18] sm:$0xff] }
   0x5   :  { %1407 = vmatprep.subr.bf16.mxu1 %v1658_v1  ;;  %1379 = vmatprep.subr.mxu0 %v17_v9  ;;  %vm258_vm4 = vmxor %vm1660_vm3, %vm257_vm2  ;;  %v1734_v15 = vpack.c.bf16 %v22_v14, %v21_v13  ;;  %v1754_v22 = vpack.c.bf16 %v20_v19, %v19_v18  ;;  %v38_v54 = vld [vmem:[%s2116_s0 + $0x10] sm:$0xff]  ;;  %v39_v56 = vld [vmem:[%s2116_s0 + $0x18] sm:$0xff] }
   0x6   :  { %1380 = vmatpush3.msra.mxu0 %v17_v9  ;;  %1381 = vmatprep.mubr.msk.f32.mxu0 %vm52_vm1, %v36_v10  ;;  %vm260_vm5 = vmxor %vm258_vm4, %vm1660_vm3 }
   0x7   :  { %1382 = vmatmul.mubr.msk.f32.vlgmr.msra.gmra.mxu0 %vm52_vm1, %v37_v12  ;;  %vm261_vm6 = vmxor %vm257_vm2, %vm1660_vm3  ;;  %1429 = vmatprep.subr.bf16.mxu0 %v1658_v1  ;;  %v1737_v16 = vsel %vm260_vm5, 1.0, %v1658_v1 }
   0x8   :  { %1408 = vmatpush3.bf16.msra.mxu1 %v1718_v11  ;;  %v1740_v17 = vsel %vm261_vm6, 1.0, %v1658_v1  ;;  %1430 = vmatpush3.bf16.msra.mxu0 %v1703_v5  ;;  %v266_v20 = vmul.f32 0.0, %v1737_v16 }
   0x9   :  { %1409 = vmatprep.subr.bf16.mxu1 %v1658_v1  ;;  %1431 = vmatprep.subr.bf16.mxu0 %v1658_v1  ;;  %v267_v21 = vmul.f32 0.0, %v1740_v17 }
   0xa   :  { %1384 = vmatprep.mubr.msk.f32.mxu0 %vm52_vm1, %v38_v54 }
   0xb   :  { %v268_v23 = vpack.c.bf16 %v267_v21, %v266_v20  ;;  %1385 = vmatmul.mubr.msk.f32.gmra.mxu0 %vm52_vm1, %v39_v56 }
   0xc   :  { %1410 = vmatpush3.bf16.msra.mxu1 %v1734_v15  ;;  %1432 = vmatpush3.bf16.msra.mxu0 %v1718_v11 }
   0xd   :  { %1411 = vmatprep.subr.bf16.mxu1 %v1658_v1  ;;  %1433 = vmatprep.subr.bf16.mxu0 %v1658_v1 }
  0x10   :  { %1412 = vmatpush3.bf16.msra.mxu1 %v1754_v22  ;;  %1434 = vmatpush3.bf16.msra.mxu0 %v1734_v15 }
  0x11   :  { %1417 = vmatprep.subr.bf16.mxu1 %v1658_v1  ;;  %1435 = vmatprep.subr.bf16.mxu0 %v1658_v1 }
  0x13   :  { %1414 = vmatmul.mubr.msk.bf16.vlgmr.msra.gmra.mxu1 %vm269_vm7, %v268_v23 }
  0x14   :  { %1418 = vmatpush3.bf16.msra.mxu1 %v1703_v5  ;;  %1425 = vmatprep.mubr.msk.bf16.mxu1 %vm1659_vm0, %v1658_v1 }
  0x15   :  { %1419 = vmatprep.subr.bf16.mxu1 %v1658_v1  ;;  %1436 = vmatpush3.bf16.msra.mxu0 %v1754_v22 }
  0x16   :  { %1453 = vmatprep.subr.bf16.mxu0 %v1658_v1 }
  0x18   :  { %1420 = vmatpush3.bf16.msra.mxu1 %v1718_v11 }
  0x19   :  { %1421 = vmatprep.subr.bf16.mxu1 %v1658_v1 }
  0x1c   :  { %1422 = vmatpush3.bf16.msra.mxu1 %v1734_v15 }
  0x1d   :  { %1423 = vmatprep.subr.bf16.mxu1 %v1658_v1 }
  0x20   :  { %1424 = vmatpush3.bf16.msra.mxu1 %v1754_v22 }
  0x21   :  { %1441 = vmatprep.subr.bf16.mxu1 %v1658_v1 }
  0xc7   :  { %v1383_v24 = vpop.f32.mrf.mxu0 }
  0xc9   :  { %v167_v25 = vpop.f32.mrf.mxu0 }
  0xcb   :  { %v1386_v7 = vpop.f32.mrf.mxu0 }
  0xcd   :  { %v177_v8 = vpop.f32.mrf.mxu0 }
  0xd3   :  { %v307_v26 = vpop.f32.mrf.mxu1 }
  0xd4   :  { %v314_v27 = vadd.f32 %v307_v26, %v167_v25 }
  0xd5   :  { %v1415_v28 = vpop.f32.mrf.mxu1 }
  0xd6   :  { %1528 = vtanh.f32 %v314_v27  ;;  %v1285_v34 = vmul.f32 -1.442695, %v314_v27 }
  0xd7   :  { %v310_v29 = vpop.f32.mrf.mxu1 }
  0xd8   :  { %v315_v30 = vadd.f32 %v1383_v24, %v310_v29 }
  0xd9   :  { %v1416_v31 = vpop.f32.mrf.mxu1 }
  0xda   :  { %1530 = vtanh.f32 %v315_v30  ;;  %v1286_v35 = vmul.f32 -1.442695, %v315_v30 }
  0xdb   :  { %1532 = vpow2.f32 %v1285_v34 }
  0xdc   :  { %1534 = vpow2.f32 %v1286_v35 }
  0xe3   :  { %v1529_v32 = vpop.eup %1528 }
  0xe4   :  { %334 = vrot.lane.b32.xlu0 %v1529_v32, %s1661_s13 }
  0xe7   :  { %v1531_v33 = vpop.eup %1530 }
  0xe8   :  { %336 = vrot.lane.b32.xlu0 %v1531_v33, %s1661_s13  ;;  %v1533_v36 = vpop.eup %1532 }
  0xe9   :  { %v322_v37 = vadd.f32 1.0, %v1533_v36  ;;  %v1535_v38 = vpop.eup %1534 }
  0xea   :  { %v323_v39 = vadd.f32 1.0, %v1535_v38 }
  0xeb   :  { %1536 = vrcp.f32 %v322_v37 }
  0xec   :  { %1538 = vrcp.f32 %v323_v39 }
  0xf8   :  { %v1537_v40 = vpop.eup %1536 }
  0xf9   :  { %v1539_v43 = vpop.eup %1538  ;;  %v330_v46 = vmul.f32 0.0, %v1537_v40 }
  0xfa   :  { %v331_v49 = vmul.f32 0.0, %v1539_v43 }
 0x156   :  { %v335_v41 = vpop.permute.xlu0 %334 }
 0x157   :  { %v340_v42 = vmul.f32 %v1537_v40, %v335_v41  ;;  %v41_v41 = vld [vmem:[%s2116_s0 + $0x28] sm:$0xff] }
 0x159   :  { %344 = vrot.lane.b32.xlu1 %v340_v42, %s1661_s13  ;;  %v42_v42 = vld [vmem:[%s2116_s0 + $0x30] sm:$0xff] }
 0x15a   :  { %v337_v44 = vpop.permute.xlu0 %336 }
 0x15b   :  { %v341_v45 = vmul.f32 %v1539_v43, %v337_v44  ;;  %v43_v44 = vld [vmem:[%s2116_s0 + $0x38] sm:$0xff] }
 0x15d   :  { %346 = vrot.lane.b32.xlu1 %v341_v45, %s1661_s13  ;;  %v44_v45 = vld [vmem:[%s2116_s0 + $0x40] sm:$0xff] }
 0x1cb   :  { %v345_v47 = vpop.permute.xlu1 %344 }
 0x1cc   :  { %v1780_v48 = vadd.f32 %v345_v47, %v330_v46  ;;  %v45_v47 = vld [vmem:[%s2116_s0 + $0x48] sm:$0xff] }
 0x1ce   :  { %1540 = vtanh.f32 %v1780_v48 }
 0x1cf   :  { %v347_v50 = vpop.permute.xlu1 %346 }
 0x1d0   :  { %v1783_v51 = vadd.f32 %v347_v50, %v331_v49  ;;  %v47_v49 = vld [vmem:[%s2116_s0 + $0x58] sm:$0xff]  ;;  %v48_v50 = vld [vmem:[%s2116_s0 + $0x60] sm:$0xff] }
 0x1d2   :  { %1542 = vtanh.f32 %v1783_v51 }
 0x1db   :  { %v1541_v52 = vpop.eup %1540 }
 0x1dc   :  { %356 = vrot.lane.b32.xlu0 %v1541_v52, %s1661_s13  ;;  %v50_v52 = vld [vmem:[%s2116_s0 + $0x70] sm:$0xff] }
 0x1df   :  { %v1543_v53 = vpop.eup %1542 }
 0x1e0   :  { %358 = vrot.lane.b32.xlu1 %v1543_v53, %s1661_s13  ;;  %v51_v53 = vld [vmem:[%s2116_s0 + $0x78] sm:$0xff] }
 0x24e   :  { %v357_v55 = vpop.permute.xlu0 %356 }
 0x24f   :  { %v362_v57 = vmul.f32 %v1537_v40, %v357_v55  ;;  %v40_v40 = vld [vmem:[%s2116_s0 + $0x20] sm:$0xff] }
 0x250   :  { %1387 = vmatprep.mubr.msk.f32.mxu0 %vm52_vm1, %v40_v40 }
 0x251   :  { %366 = vrot.lane.b32.xlu0 %v362_v57, %s1662_s18  ;;  %1388 = vmatmul.mubr.msk.f32.gmra.mxu0 %vm52_vm1, %v41_v41 }
 0x252   :  { %v359_v58 = vpop.permute.xlu1 %358  ;;  %1390 = vmatprep.mubr.msk.f32.mxu0 %vm52_vm1, %v42_v42 }
 0x253   :  { %v363_v59 = vmul.f32 %v1539_v43, %v359_v58 }
 0x255   :  { %368 = vrot.lane.b32.xlu1 %v363_v59, %s1662_s18  ;;  %372 = vrot.lane.b32.xlu0 %v362_v57, %s1663_s19 }
 0x256   :  { %1391 = vmatmul.mubr.msk.f32.gmra.mxu0 %vm52_vm1, %v43_v44 }
 0x257   :  { %1393 = vmatprep.mubr.msk.f32.mxu0 %vm52_vm1, %v44_v45 }
 0x259   :  { %374 = vrot.lane.b32.xlu1 %v363_v59, %s1663_s19 }
 0x25a   :  { %1394 = vmatmul.mubr.msk.f32.gmra.mxu0 %vm52_vm1, %v45_v47 }
 0x2c3   :  { %v367_v60 = vpop.permute.xlu0 %366 }
 0x2c7   :  { %v369_v61 = vpop.permute.xlu1 %368  ;;  %v373_v62 = vpop.permute.xlu0 %372 }
 0x2c8   :  { %v379_v63 = vsel %vm378_vm8, %v367_v60, %v373_v62 }
 0x2c9   :  { %v381_v3 = vmul.f32 %v1737_v16, %v379_v63 }
 0x2cb   :  { %v375_v0 = vpop.permute.xlu1 %374 }
 0x2cc   :  { %v380_v2 = vsel %vm378_vm8, %v369_v61, %v375_v0 }
 0x2cd   :  { %v382_v4 = vmul.f32 %v1740_v17, %v380_v2 }
 0x2cf   :  { %v383_v6 = vpack.c.bf16 %v382_v4, %v381_v3 }
 0x2d1   :  { %1426 = vmatmul.mubr.msk.bf16.vlgmr.msra.gmra.mxu1 %vm269_vm7, %v383_v6 }
 0x2d2   :  { %1442 = vmatpush3.bf16.msra.mxu1 %v1703_v5  ;;  %1449 = vmatprep.mubr.msk.bf16.mxu1 %vm1659_vm0, %v1658_v1 }
 0x2d3   :  { %1443 = vmatprep.subr.bf16.mxu1 %v1658_v1 }
 0x2d6   :  { %1444 = vmatpush3.bf16.msra.mxu1 %v1718_v11 }
 0x2d7   :  { %1445 = vmatprep.subr.bf16.mxu1 %v1658_v1 }
 0x2da   :  { %1446 = vmatpush3.bf16.msra.mxu1 %v1734_v15 }
 0x2db   :  { %1447 = vmatprep.subr.bf16.mxu1 %v1658_v1 }
 0x2de   :  { %1448 = vmatpush3.bf16.msra.mxu1 %v1754_v22 }
 0x2df   :  { %1465 = vmatprep.subr.bf16.mxu1 %v1658_v1 }
 0x311   :  { %v1389_v4 = vpop.f32.mrf.mxu0 }
 0x313   :  { %v187_v6 = vpop.f32.mrf.mxu0 }
 0x391   :  { %v421_v9 = vpop.f32.mrf.mxu1 }
 0x392   :  { %v428_v10 = vadd.f32 %v421_v9, %v177_v8 }
 0x393   :  { %v1427_v12 = vpop.f32.mrf.mxu1 }
 0x394   :  { %1544 = vtanh.f32 %v428_v10  ;;  %v1288_v21 = vmul.f32 -1.442695, %v428_v10 }
 0x395   :  { %v424_v13 = vpop.f32.mrf.mxu1 }
 0x396   :  { %v429_v14 = vadd.f32 %v1386_v7, %v424_v13  ;;  %v1898_v7 = vpop.f32.mrf.mxu0 }
 0x397   :  { %v1428_v18 = vpop.f32.mrf.mxu1 }
 0x398   :  { %1546 = vtanh.f32 %v429_v14  ;;  %v1289_v23 = vmul.f32 -1.442695, %v429_v14  ;;  %v1900_v8 = vpop.f32.mrf.mxu0 }
 0x399   :  { %1548 = vpow2.f32 %v1288_v21 }
 0x39a   :  { %1550 = vpow2.f32 %v1289_v23  ;;  %v1902_v9 = vpop.f32.mrf.mxu0 }
 0x39c   :  { %v1904_v10 = vpop.f32.mrf.mxu0 }
 0x3a1   :  { %v1545_v19 = vpop.eup %1544 }
 0x3a2   :  { %448 = vrot.lane.b32.xlu0 %v1545_v19, %s1661_s13 }
 0x3a5   :  { %v1547_v20 = vpop.eup %1546 }
 0x3a6   :  { %450 = vrot.lane.b32.xlu1 %v1547_v20, %s1661_s13  ;;  %v1549_v24 = vpop.eup %1548 }
 0x3a7   :  { %v436_v25 = vadd.f32 1.0, %v1549_v24  ;;  %v1551_v26 = vpop.eup %1550 }
 0x3a8   :  { %v437_v27 = vadd.f32 1.0, %v1551_v26 }
 0x3a9   :  { %1552 = vrcp.f32 %v436_v25 }
 0x3aa   :  { %1554 = vrcp.f32 %v437_v27 }
 0x3b6   :  { %v1553_v28 = vpop.eup %1552 }
 0x3b7   :  { %v1555_v31 = vpop.eup %1554  ;;  %v444_v34 = vmul.f32 %v1553_v28, %v1780_v48  ;;  %v46_v48 = vld [vmem:[%s2116_s0 + $0x50] sm:$0xff] }
 0x3b8   :  { %v445_v37 = vmul.f32 %v1555_v31, %v1783_v51  ;;  %1396 = vmatprep.mubr.msk.f32.mxu0 %vm52_vm1, %v46_v48  ;;  %v49_v51 = vld [vmem:[%s2116_s0 + $0x68] sm:$0xff] }
 0x3b9   :  { %1397 = vmatmul.mubr.msk.f32.gmra.mxu0 %vm52_vm1, %v47_v49 }
 0x3ba   :  { %1399 = vmatprep.mubr.msk.f32.mxu0 %vm52_vm1, %v48_v50 }
 0x3bd   :  { %1400 = vmatmul.mubr.msk.f32.gmra.mxu0 %vm52_vm1, %v49_v51 }
 0x3be   :  { %1402 = vmatprep.mubr.msk.f32.mxu0 %vm52_vm1, %v50_v52 }
 0x3c1   :  { %1403 = vmatmul.mubr.msk.f32.gmra.mxu0 %vm52_vm1, %v51_v53 }
 0x3c2   :  { %1437 = vmatprep.mubr.msk.bf16.mxu0 %vm1659_vm0, %v1658_v1 }
 0x414   :  { %v449_v29 = vpop.permute.xlu0 %448 }
 0x415   :  { %v454_v30 = vmul.f32 %v1553_v28, %v449_v29 }
 0x417   :  { %458 = vrot.lane.b32.xlu0 %v454_v30, %s1661_s13 }
 0x418   :  { %v451_v32 = vpop.permute.xlu1 %450 }
 0x419   :  { %v455_v33 = vmul.f32 %v1555_v31, %v451_v32 }
 0x41b   :  { %460 = vrot.lane.b32.xlu1 %v455_v33, %s1661_s13 }
 0x479   :  { %v1906_v12 = vpop.f32.mrf.mxu0 }
 0x47b   :  { %v1908_v13 = vpop.f32.mrf.mxu0 }
 0x47d   :  { %v1910_v14 = vpop.f32.mrf.mxu0 }
 0x47f   :  { %v1912_v18 = vpop.f32.mrf.mxu0 }
 0x481   :  { %v1914_v19 = vpop.f32.mrf.mxu0 }
 0x483   :  { %v1916_v20 = vpop.f32.mrf.mxu0 }
 0x489   :  { %v459_v35 = vpop.permute.xlu0 %458 }
 0x48a   :  { %v1820_v36 = vadd.f32 %v459_v35, %v444_v34 }
 0x48c   :  { %1556 = vtanh.f32 %v1820_v36 }
 0x48d   :  { %v461_v38 = vpop.permute.xlu1 %460 }
 0x48e   :  { %v1824_v39 = vadd.f32 %v461_v38, %v445_v37 }
 0x490   :  { %1558 = vtanh.f32 %v1824_v39 }
 0x499   :  { %v1557_v43 = vpop.eup %1556 }
 0x49a   :  { %470 = vrot.lane.b32.xlu0 %v1557_v43, %s1661_s13 }
 0x49d   :  { %v1559_v46 = vpop.eup %1558 }
 0x49e   :  { %472 = vrot.lane.b32.xlu1 %v1559_v46, %s1661_s13 }
 0x50c   :  { %v471_v54 = vpop.permute.xlu0 %470 }
 0x50d   :  { %v476_v55 = vmul.f32 %v1553_v28, %v471_v54 }
 0x50f   :  { %480 = vrot.lane.b32.xlu0 %v476_v55, %s1662_s18 }
 0x510   :  { %v473_v56 = vpop.permute.xlu1 %472 }
 0x511   :  { %v477_v57 = vmul.f32 %v1555_v31, %v473_v56 }
 0x513   :  { %482 = vrot.lane.b32.xlu1 %v477_v57, %s1662_s18  ;;  %486 = vrot.lane.b32.xlu0 %v476_v55, %s1663_s19 }
 0x517   :  { %488 = vrot.lane.b32.xlu1 %v477_v57, %s1663_s19 }
 0x581   :  { %v481_v58 = vpop.permute.xlu0 %480 }
 0x585   :  { %v483_v59 = vpop.permute.xlu1 %482  ;;  %v487_v60 = vpop.permute.xlu0 %486 }
 0x586   :  { %v492_v61 = vsel %vm378_vm8, %v481_v58, %v487_v60 }
 0x587   :  { %v494_v0 = vmul.f32 %v1737_v16, %v492_v61 }
 0x589   :  { %v489_v62 = vpop.permute.xlu1 %488 }
 0x58a   :  { %v493_v63 = vsel %vm378_vm8, %v483_v59, %v489_v62 }
 0x58b   :  { %v495_v2 = vmul.f32 %v1740_v17, %v493_v63 }
 0x58d   :  { %v496_v3 = vpack.c.bf16 %v495_v2, %v494_v0 }
 0x58f   :  { %1438 = vmatmul.mubr.msk.bf16.vlgmr.msra.gmra.mxu0 %vm269_vm7, %v496_v3 }
 0x590   :  { %1454 = vmatpush3.bf16.msra.mxu0 %v1703_v5  ;;  %1461 = vmatprep.mubr.msk.bf16.mxu0 %vm1659_vm0, %v1658_v1 }
 0x591   :  { %1455 = vmatprep.subr.bf16.mxu0 %v1658_v1 }
 0x594   :  { %1456 = vmatpush3.bf16.msra.mxu0 %v1718_v11 }
 0x595   :  { %1457 = vmatprep.subr.bf16.mxu0 %v1658_v1 }
 0x598   :  { %1458 = vmatpush3.bf16.msra.mxu0 %v1734_v15 }
 0x599   :  { %1459 = vmatprep.subr.bf16.mxu0 %v1658_v1 }
 0x59c   :  { %1460 = vmatpush3.bf16.msra.mxu0 %v1754_v22 }
 0x59d   :  { %1477 = vmatprep.subr.bf16.mxu0 %v1658_v1 }
 0x64f   :  { %v534_v21 = vpop.f32.mrf.mxu0 }
 0x650   :  { %v541_v23 = vadd.f32 %v534_v21, %v187_v6 }
 0x651   :  { %v1439_v24 = vpop.f32.mrf.mxu0 }
 0x652   :  { %1560 = vtanh.f32 %v541_v23  ;;  %v1291_v30 = vmul.f32 -1.442695, %v541_v23 }
 0x653   :  { %v537_v25 = vpop.f32.mrf.mxu0 }
 0x654   :  { %v542_v26 = vadd.f32 %v1389_v4, %v537_v25 }
 0x655   :  { %v1440_v27 = vpop.f32.mrf.mxu0 }
 0x656   :  { %1562 = vtanh.f32 %v542_v26  ;;  %v1292_v31 = vmul.f32 -1.442695, %v542_v26 }
 0x657   :  { %1564 = vpow2.f32 %v1291_v30 }
 0x658   :  { %1566 = vpow2.f32 %v1292_v31 }
 0x65f   :  { %v1561_v28 = vpop.eup %1560 }
 0x660   :  { %561 = vrot.lane.b32.xlu0 %v1561_v28, %s1661_s13 }
 0x663   :  { %v1563_v29 = vpop.eup %1562 }
 0x664   :  { %563 = vrot.lane.b32.xlu1 %v1563_v29, %s1661_s13  ;;  %v1565_v32 = vpop.eup %1564 }
 0x665   :  { %v549_v33 = vadd.f32 1.0, %v1565_v32  ;;  %v1567_v34 = vpop.eup %1566 }
 0x666   :  { %v550_v35 = vadd.f32 1.0, %v1567_v34 }
 0x667   :  { %1568 = vrcp.f32 %v549_v33 }
 0x668   :  { %1570 = vrcp.f32 %v550_v35 }
 0x674   :  { %v1569_v37 = vpop.eup %1568 }
 0x675   :  { %v1571_v41 = vpop.eup %1570  ;;  %v557_v44 = vmul.f32 %v1569_v37, %v1820_v36 }
 0x676   :  { %v558_v47 = vmul.f32 %v1571_v41, %v1824_v39 }
 0x6d2   :  { %v562_v38 = vpop.permute.xlu0 %561 }
 0x6d3   :  { %v567_v40 = vmul.f32 %v1569_v37, %v562_v38 }
 0x6d5   :  { %571 = vrot.lane.b32.xlu0 %v567_v40, %s1661_s13 }
 0x6d6   :  { %v564_v42 = vpop.permute.xlu1 %563 }
 0x6d7   :  { %v568_v43 = vmul.f32 %v1571_v41, %v564_v42 }
 0x6d9   :  { %573 = vrot.lane.b32.xlu1 %v568_v43, %s1661_s13 }
 0x747   :  { %v572_v45 = vpop.permute.xlu0 %571 }
 0x748   :  { %v1923_v46 = vadd.f32 %v572_v45, %v557_v44 }
 0x74a   :  { %1572 = vtanh.f32 %v1923_v46 }
 0x74b   :  { %v574_v48 = vpop.permute.xlu1 %573 }
 0x74c   :  { %v1927_v49 = vadd.f32 %v574_v48, %v558_v47 }
 0x74e   :  { %1574 = vtanh.f32 %v1927_v49 }
 0x757   :  { %v1573_v50 = vpop.eup %1572 }
 0x758   :  { %583 = vrot.lane.b32.xlu0 %v1573_v50, %s1661_s13 }
 0x75b   :  { %v1575_v51 = vpop.eup %1574 }
 0x75c   :  { %585 = vrot.lane.b32.xlu1 %v1575_v51, %s1661_s13 }
 0x7ca   :  { %v584_v52 = vpop.permute.xlu0 %583 }
 0x7cb   :  { %v589_v36 = vmul.f32 %v1569_v37, %v584_v52 }
 0x7cd   :  { %593 = vrot.lane.b32.xlu0 %v589_v36, %s1662_s18 }
 0x7ce   :  { %v586_v53 = vpop.permute.xlu1 %585 }
 0x7cf   :  { %v590_v54 = vmul.f32 %v1571_v41, %v586_v53 }
 0x7d1   :  { %599 = vrot.lane.b32.xlu0 %v589_v36, %s1663_s19  ;;  %595 = vrot.lane.b32.xlu1 %v590_v54, %s1662_s18 }
 0x7d5   :  { %601 = vrot.lane.b32.xlu1 %v590_v54, %s1663_s19 }
 0x83f   :  { %v594_v39 = vpop.permute.xlu0 %593 }
 0x843   :  { %v600_v55 = vpop.permute.xlu0 %599  ;;  %v596_v56 = vpop.permute.xlu1 %595 }
 0x844   :  { %v605_v57 = vsel %vm378_vm8, %v594_v39, %v600_v55 }
 0x845   :  { %v607_v60 = vmul.f32 %v1737_v16, %v605_v57 }
 0x847   :  { %v602_v58 = vpop.permute.xlu1 %601 }
 0x848   :  { %v606_v59 = vsel %vm378_vm8, %v596_v56, %v602_v58 }
 0x849   :  { %v608_v61 = vmul.f32 %v1740_v17, %v606_v59 }
 0x84b   :  { %v609_v62 = vpack.c.bf16 %v608_v61, %v607_v60 }
 0x84d   :  { %1450 = vmatmul.mubr.msk.bf16.vlgmr.msra.gmra.mxu1 %vm269_vm7, %v609_v62 }
 0x84e   :  { %1466 = vmatpush3.bf16.msra.mxu1 %v1703_v5  ;;  %1473 = vmatprep.mubr.msk.bf16.mxu1 %vm1659_vm0, %v1658_v1 }
 0x84f   :  { %1467 = vmatprep.subr.bf16.mxu1 %v1658_v1 }
 0x852   :  { %1468 = vmatpush3.bf16.msra.mxu1 %v1718_v11 }
 0x853   :  { %1469 = vmatprep.subr.bf16.mxu1 %v1658_v1 }
 0x856   :  { %1470 = vmatpush3.bf16.msra.mxu1 %v1734_v15 }
 0x857   :  { %1471 = vmatprep.subr.bf16.mxu1 %v1658_v1 }
 0x85a   :  { %1472 = vmatpush3.bf16.msra.mxu1 %v1754_v22 }
 0x85b   :  { %1489 = vmatprep.subr.bf16.mxu1 %v1658_v1 }
 0x90d   :  { %v647_v63 = vpop.f32.mrf.mxu1 }
 0x90e   :  { %v654_v0 = vadd.f32 %v647_v63, %v1900_v8 }
 0x90f   :  { %v1451_v2 = vpop.f32.mrf.mxu1 }
 0x910   :  { %1576 = vtanh.f32 %v654_v0  ;;  %v1294_v24 = vmul.f32 -1.442695, %v654_v0 }
 0x911   :  { %v650_v3 = vpop.f32.mrf.mxu1 }
 0x912   :  { %v655_v4 = vadd.f32 %v1898_v7, %v650_v3 }
 0x913   :  { %v1452_v6 = vpop.f32.mrf.mxu1 }
 0x914   :  { %1578 = vtanh.f32 %v655_v4  ;;  %v1295_v25 = vmul.f32 -1.442695, %v655_v4 }
 0x915   :  { %1580 = vpow2.f32 %v1294_v24 }
 0x916   :  { %1582 = vpow2.f32 %v1295_v25 }
 0x91d   :  { %v1577_v21 = vpop.eup %1576 }
 0x91e   :  { %674 = vrot.lane.b32.xlu0 %v1577_v21, %s1661_s13 }
 0x921   :  { %v1579_v23 = vpop.eup %1578 }
 0x922   :  { %676 = vrot.lane.b32.xlu1 %v1579_v23, %s1661_s13  ;;  %v1581_v26 = vpop.eup %1580 }
 0x923   :  { %v662_v27 = vadd.f32 1.0, %v1581_v26  ;;  %v1583_v8 = vpop.eup %1582 }
 0x924   :  { %v663_v28 = vadd.f32 1.0, %v1583_v8 }
 0x925   :  { %1584 = vrcp.f32 %v662_v27 }
 0x926   :  { %1586 = vrcp.f32 %v663_v28 }
 0x932   :  { %v1585_v29 = vpop.eup %1584 }
 0x933   :  { %v1587_v31 = vpop.eup %1586  ;;  %v670_v34 = vmul.f32 %v1585_v29, %v1923_v46 }
 0x934   :  { %v671_v38 = vmul.f32 %v1587_v31, %v1927_v49 }
 0x990   :  { %v675_v7 = vpop.permute.xlu0 %674 }
 0x991   :  { %v680_v30 = vmul.f32 %v1585_v29, %v675_v7 }
 0x993   :  { %684 = vrot.lane.b32.xlu0 %v680_v30, %s1661_s13 }
 0x994   :  { %v677_v32 = vpop.permute.xlu1 %676 }
 0x995   :  { %v681_v33 = vmul.f32 %v1587_v31, %v677_v32 }
 0x997   :  { %686 = vrot.lane.b32.xlu1 %v681_v33, %s1661_s13 }
 0xa05   :  { %v685_v35 = vpop.permute.xlu0 %684 }
 0xa06   :  { %v1958_v37 = vadd.f32 %v685_v35, %v670_v34 }
 0xa08   :  { %1588 = vtanh.f32 %v1958_v37 }
 0xa09   :  { %v687_v40 = vpop.permute.xlu1 %686 }
 0xa0a   :  { %v1962_v41 = vadd.f32 %v687_v40, %v671_v38 }
 0xa0c   :  { %1590 = vtanh.f32 %v1962_v41 }
 0xa15   :  { %v1589_v42 = vpop.eup %1588 }
 0xa16   :  { %696 = vrot.lane.b32.xlu0 %v1589_v42, %s1661_s13 }
 0xa19   :  { %v1591_v43 = vpop.eup %1590 }
 0xa1a   :  { %698 = vrot.lane.b32.xlu1 %v1591_v43, %s1661_s13 }
 0xa88   :  { %v697_v44 = vpop.permute.xlu0 %696 }
 0xa89   :  { %v702_v45 = vmul.f32 %v1585_v29, %v697_v44 }
 0xa8b   :  { %706 = vrot.lane.b32.xlu0 %v702_v45, %s1662_s18 }
 0xa8c   :  { %v699_v46 = vpop.permute.xlu1 %698 }
 0xa8d   :  { %v703_v47 = vmul.f32 %v1587_v31, %v699_v46 }
 0xa8f   :  { %712 = vrot.lane.b32.xlu0 %v702_v45, %s1663_s19  ;;  %708 = vrot.lane.b32.xlu1 %v703_v47, %s1662_s18 }
 0xa93   :  { %714 = vrot.lane.b32.xlu1 %v703_v47, %s1663_s19 }
 0xafd   :  { %v707_v48 = vpop.permute.xlu0 %706 }
 0xb01   :  { %v713_v49 = vpop.permute.xlu0 %712  ;;  %v709_v50 = vpop.permute.xlu1 %708 }
 0xb02   :  { %v718_v51 = vsel %vm378_vm8, %v707_v48, %v713_v49 }
 0xb03   :  { %v720_v53 = vmul.f32 %v1737_v16, %v718_v51 }
 0xb05   :  { %v715_v52 = vpop.permute.xlu1 %714 }
 0xb06   :  { %v719_v36 = vsel %vm378_vm8, %v709_v50, %v715_v52 }
 0xb07   :  { %v721_v54 = vmul.f32 %v1740_v17, %v719_v36 }
 0xb09   :  { %v722_v39 = vpack.c.bf16 %v721_v54, %v720_v53 }
 0xb0b   :  { %1462 = vmatmul.mubr.msk.bf16.vlgmr.msra.gmra.mxu0 %vm269_vm7, %v722_v39 }
 0xb0c   :  { %1478 = vmatpush3.bf16.msra.mxu0 %v1703_v5  ;;  %1485 = vmatprep.mubr.msk.bf16.mxu0 %vm1659_vm0, %v1658_v1 }
 0xb0d   :  { %1479 = vmatprep.subr.bf16.mxu0 %v1658_v1 }
 0xb10   :  { %1480 = vmatpush3.bf16.msra.mxu0 %v1718_v11 }
 0xb11   :  { %1481 = vmatprep.subr.bf16.mxu0 %v1658_v1 }
 0xb14   :  { %1482 = vmatpush3.bf16.msra.mxu0 %v1734_v15 }
 0xb15   :  { %1483 = vmatprep.subr.bf16.mxu0 %v1658_v1 }
 0xb18   :  { %1484 = vmatpush3.bf16.msra.mxu0 %v1754_v22 }
 0xb19   :  { %1501 = vmatprep.subr.mxu0 %v1658_v1 }
 0xbcb   :  { %v760_v55 = vpop.f32.mrf.mxu0 }
 0xbcc   :  { %v767_v56 = vadd.f32 %v760_v55, %v1904_v10 }
 0xbcd   :  { %v1463_v57 = vpop.f32.mrf.mxu0 }
 0xbce   :  { %1592 = vtanh.f32 %v767_v56  ;;  %v1297_v63 = vmul.f32 -1.442695, %v767_v56 }
 0xbcf   :  { %v763_v58 = vpop.f32.mrf.mxu0 }
 0xbd0   :  { %v768_v59 = vadd.f32 %v1902_v9, %v763_v58 }
 0xbd1   :  { %v1464_v60 = vpop.f32.mrf.mxu0 }
 0xbd2   :  { %1594 = vtanh.f32 %v768_v59  ;;  %v1298_v0 = vmul.f32 -1.442695, %v768_v59 }
 0xbd3   :  { %1596 = vpow2.f32 %v1297_v63 }
 0xbd4   :  { %1598 = vpow2.f32 %v1298_v0 }
 0xbdb   :  { %v1593_v61 = vpop.eup %1592 }
 0xbdc   :  { %787 = vrot.lane.b32.xlu0 %v1593_v61, %s1661_s13 }
 0xbdf   :  { %v1595_v62 = vpop.eup %1594 }
 0xbe0   :  { %789 = vrot.lane.b32.xlu1 %v1595_v62, %s1661_s13  ;;  %v1597_v2 = vpop.eup %1596 }
 0xbe1   :  { %v775_v3 = vadd.f32 1.0, %v1597_v2  ;;  %v1599_v10 = vpop.eup %1598 }
 0xbe2   :  { %v776_v4 = vadd.f32 1.0, %v1599_v10 }
 0xbe3   :  { %1600 = vrcp.f32 %v775_v3 }
 0xbe4   :  { %1602 = vrcp.f32 %v776_v4 }
 0xbf0   :  { %v1601_v6 = vpop.eup %1600 }
 0xbf1   :  { %v1603_v23 = vpop.eup %1602  ;;  %v783_v26 = vmul.f32 %v1601_v6, %v1958_v37 }
 0xbf2   :  { %v784_v28 = vmul.f32 %v1603_v23, %v1962_v41 }
 0xc4e   :  { %v788_v9 = vpop.permute.xlu0 %787 }
 0xc4f   :  { %v793_v21 = vmul.f32 %v1601_v6, %v788_v9 }
 0xc51   :  { %797 = vrot.lane.b32.xlu0 %v793_v21, %s1661_s13 }
 0xc52   :  { %v790_v24 = vpop.permute.xlu1 %789 }
 0xc53   :  { %v794_v25 = vmul.f32 %v1603_v23, %v790_v24 }
 0xc55   :  { %799 = vrot.lane.b32.xlu1 %v794_v25, %s1661_s13 }
 0xcc3   :  { %v798_v27 = vpop.permute.xlu0 %797 }
 0xcc4   :  { %v1993_v8 = vadd.f32 %v798_v27, %v783_v26 }
 0xcc6   :  { %1604 = vtanh.f32 %v1993_v8 }
 0xcc7   :  { %v800_v29 = vpop.permute.xlu1 %799 }
 0xcc8   :  { %v1997_v7 = vadd.f32 %v800_v29, %v784_v28 }
 0xcca   :  { %1606 = vtanh.f32 %v1997_v7 }
 0xcd3   :  { %v1605_v30 = vpop.eup %1604 }
 0xcd4   :  { %809 = vrot.lane.b32.xlu0 %v1605_v30, %s1661_s13 }
 0xcd7   :  { %v1607_v31 = vpop.eup %1606 }
 0xcd8   :  { %811 = vrot.lane.b32.xlu1 %v1607_v31, %s1661_s13 }
 0xd46   :  { %v810_v32 = vpop.permute.xlu0 %809 }
 0xd47   :  { %v815_v33 = vmul.f32 %v1601_v6, %v810_v32 }
 0xd49   :  { %819 = vrot.lane.b32.xlu0 %v815_v33, %s1662_s18 }
 0xd4a   :  { %v812_v34 = vpop.permute.xlu1 %811 }
 0xd4b   :  { %v816_v35 = vmul.f32 %v1603_v23, %v812_v34 }
 0xd4d   :  { %825 = vrot.lane.b32.xlu0 %v815_v33, %s1663_s19  ;;  %821 = vrot.lane.b32.xlu1 %v816_v35, %s1662_s18 }
 0xd51   :  { %827 = vrot.lane.b32.xlu1 %v816_v35, %s1663_s19 }
 0xdbb   :  { %v820_v37 = vpop.permute.xlu0 %819 }
 0xdbf   :  { %v826_v38 = vpop.permute.xlu0 %825  ;;  %v822_v40 = vpop.permute.xlu1 %821 }
 0xdc0   :  { %v831_v41 = vsel %vm378_vm8, %v820_v37, %v826_v38 }
 0xdc1   :  { %v833_v44 = vmul.f32 %v1737_v16, %v831_v41 }
 0xdc3   :  { %v828_v42 = vpop.permute.xlu1 %827 }
 0xdc4   :  { %v832_v43 = vsel %vm378_vm8, %v822_v40, %v828_v42 }
 0xdc5   :  { %v834_v45 = vmul.f32 %v1740_v17, %v832_v43 }
 0xdc7   :  { %v835_v46 = vpack.c.bf16 %v834_v45, %v833_v44 }
 0xdc9   :  { %1474 = vmatmul.mubr.msk.bf16.vlgmr.msra.gmra.mxu1 %vm269_vm7, %v835_v46 }
 0xdca   :  { %1490 = vmatpush3.bf16.msra.mxu1 %v1703_v5  ;;  %1497 = vmatprep.mubr.msk.bf16.mxu1 %vm1659_vm0, %v1658_v1 }
 0xdcb   :  { %1491 = vmatprep.subr.bf16.mxu1 %v1658_v1 }
 0xdce   :  { %1492 = vmatpush3.bf16.msra.mxu1 %v1718_v11 }
 0xdcf   :  { %1493 = vmatprep.subr.bf16.mxu1 %v1658_v1 }
 0xdd2   :  { %1494 = vmatpush3.bf16.msra.mxu1 %v1734_v15 }
 0xdd3   :  { %1495 = vmatprep.subr.bf16.mxu1 %v1658_v1 }
 0xdd6   :  { %1496 = vmatpush3.bf16.msra.mxu1 %v1754_v22 }
 0xe89   :  { %v873_v47 = vpop.f32.mrf.mxu1 }
 0xe8a   :  { %v880_v48 = vadd.f32 %v873_v47, %v1908_v13 }
 0xe8b   :  { %v1475_v49 = vpop.f32.mrf.mxu1 }
 0xe8c   :  { %1608 = vtanh.f32 %v880_v48  ;;  %v1300_v15 = vmul.f32 -1.442695, %v880_v48 }
 0xe8d   :  { %v876_v5 = vpop.f32.mrf.mxu1 }
 0xe8e   :  { %v881_v50 = vadd.f32 %v1906_v12, %v876_v5 }
 0xe8f   :  { %v1476_v51 = vpop.f32.mrf.mxu1 }
 0xe90   :  { %1610 = vtanh.f32 %v881_v50  ;;  %v1301_v36 = vmul.f32 -1.442695, %v881_v50 }
 0xe91   :  { %1612 = vpow2.f32 %v1300_v15 }
 0xe92   :  { %1614 = vpow2.f32 %v1301_v36 }
 0xe99   :  { %v1609_v52 = vpop.eup %1608 }
 0xe9a   :  { %900 = vrot.lane.b32.xlu0 %v1609_v52, %s1661_s13 }
 0xe9d   :  { %v1611_v11 = vpop.eup %1610 }
 0xe9e   :  { %902 = vrot.lane.b32.xlu1 %v1611_v11, %s1661_s13  ;;  %v1613_v22 = vpop.eup %1612 }
 0xe9f   :  { %v888_v53 = vadd.f32 1.0, %v1613_v22  ;;  %v1615_v13 = vpop.eup %1614 }
 0xea0   :  { %v889_v54 = vadd.f32 1.0, %v1615_v13 }
 0xea1   :  { %1616 = vrcp.f32 %v888_v53 }
 0xea2   :  { %1618 = vrcp.f32 %v889_v54 }
 0xeae   :  { %v1617_v39 = vpop.eup %1616 }
 0xeaf   :  { %v1619_v56 = vpop.eup %1618  ;;  %v896_v59 = vmul.f32 %v1617_v39, %v1993_v8 }
 0xeb0   :  { %v897_v62 = vmul.f32 %v1619_v56, %v1997_v7 }
 0xf0c   :  { %v901_v12 = vpop.permute.xlu0 %900 }
 0xf0d   :  { %v906_v55 = vmul.f32 %v1617_v39, %v901_v12 }
 0xf0f   :  { %910 = vrot.lane.b32.xlu0 %v906_v55, %s1661_s13 }
 0xf10   :  { %v903_v57 = vpop.permute.xlu1 %902 }
 0xf11   :  { %v907_v58 = vmul.f32 %v1619_v56, %v903_v57 }
 0xf13   :  { %912 = vrot.lane.b32.xlu1 %v907_v58, %s1661_s13 }
 0xf81   :  { %v911_v60 = vpop.permute.xlu0 %910 }
 0xf82   :  { %v916_v61 = vadd.f32 %v911_v60, %v896_v59 }
 0xf84   :  { %1620 = vtanh.f32 %v916_v61 }
 0xf85   :  { %v913_v63 = vpop.permute.xlu1 %912 }
 0xf86   :  { %v917_v0 = vadd.f32 %v913_v63, %v897_v62 }
 0xf88   :  { %1622 = vtanh.f32 %v917_v0 }
 0xf91   :  { %v1621_v2 = vpop.eup %1620 }
 0xf92   :  { %922 = vrot.lane.b32.xlu0 %v1621_v2, %s1661_s13 }
 0xf95   :  { %v1623_v3 = vpop.eup %1622 }
 0xf96   :  { %924 = vrot.lane.b32.xlu1 %v1623_v3, %s1661_s13 }
0x1004   :  { %v923_v10 = vpop.permute.xlu0 %922 }
0x1005   :  { %v928_v4 = vmul.f32 %v1617_v39, %v923_v10 }
0x1007   :  { %932 = vrot.lane.b32.xlu0 %v928_v4, %s1662_s18 }
0x1008   :  { %v925_v6 = vpop.permute.xlu1 %924 }
0x1009   :  { %v929_v9 = vmul.f32 %v1619_v56, %v925_v6 }
0x100b   :  { %938 = vrot.lane.b32.xlu0 %v928_v4, %s1663_s19  ;;  %934 = vrot.lane.b32.xlu1 %v929_v9, %s1662_s18 }
0x100f   :  { %940 = vrot.lane.b32.xlu1 %v929_v9, %s1663_s19 }
0x1079   :  { %v933_v21 = vpop.permute.xlu0 %932 }
0x107d   :  { %v939_v23 = vpop.permute.xlu0 %938  ;;  %v935_v24 = vpop.permute.xlu1 %934 }
0x107e   :  { %v944_v25 = vsel %vm378_vm8, %v933_v21, %v939_v23 }
0x107f   :  { %v946_v8 = vmul.f32 %v1737_v16, %v944_v25 }
0x1081   :  { %v941_v26 = vpop.permute.xlu1 %940 }
0x1082   :  { %v945_v27 = vsel %vm378_vm8, %v935_v24, %v941_v26 }
0x1083   :  { %v947_v28 = vmul.f32 %v1740_v17, %v945_v27 }
0x1085   :  { %v948_v29 = vpack.c.bf16 %v947_v28, %v946_v8 }
0x1087   :  { %1486 = vmatmul.mubr.msk.bf16.vlgmr.msra.gmra.mxu0 %vm269_vm7, %v948_v29 }
0x1088   :  { %1517 = vmatprep.mubr.msk.f32.mxu0 %vm1659_vm0, %v1658_v1 }
0x1147   :  { %v986_v7 = vpop.f32.mrf.mxu0 }
0x1148   :  { %v993_v30 = vadd.f32 %v986_v7, %v1912_v18 }
0x1149   :  { %v1487_v31 = vpop.f32.mrf.mxu0 }
0x114a   :  { %1624 = vtanh.f32 %v993_v30  ;;  %v1303_v38 = vmul.f32 -1.442695, %v993_v30 }
0x114b   :  { %v989_v32 = vpop.f32.mrf.mxu0 }
0x114c   :  { %v994_v33 = vadd.f32 %v1910_v14, %v989_v32 }
0x114d   :  { %v1488_v34 = vpop.f32.mrf.mxu0 }
0x114e   :  { %1626 = vtanh.f32 %v994_v33  ;;  %v1304_v40 = vmul.f32 -1.442695, %v994_v33  ;;  %v34_v33 = vld [vmem:[%s2115_s1 + $0x88] sm:$0xff]  ;;  %v33_v34 = vld [vmem:[%s2115_s1 + $0x80] sm:$0xff] }
0x114f   :  { %1628 = vpow2.f32 %v1303_v38  ;;  %1502 = vmatpush3.msra.mxu0 %v34_v33 }
0x1150   :  { %1630 = vpow2.f32 %v1304_v40  ;;  %1503 = vmatprep.subr.mxu0 %v1658_v1  ;;  %v30_v40 = vld [vmem:[%s2115_s1 + $0x68] sm:$0xff] }
0x1151   :  { %1504 = vmatpush3.msra.mxu0 %v33_v34 }
0x1152   :  { %1505 = vmatprep.subr.mxu0 %v1658_v1 }
0x1157   :  { %v1625_v35 = vpop.eup %1624 }
0x1158   :  { %1013 = vrot.lane.b32.xlu0 %v1625_v35, %s1661_s13  ;;  %v32_v35 = vld [vmem:[%s2115_s1 + $0x78] sm:$0xff] }
0x1159   :  { %1506 = vmatpush3.msra.mxu0 %v32_v35 }
0x115a   :  { %1507 = vmatprep.subr.mxu0 %v1658_v1 }
0x115b   :  { %v1627_v37 = vpop.eup %1626 }
0x115c   :  { %1015 = vrot.lane.b32.xlu1 %v1627_v37, %s1661_s13  ;;  %v1629_v41 = vpop.eup %1628  ;;  %v31_v37 = vld [vmem:[%s2115_s1 + $0x70] sm:$0xff] }
0x115d   :  { %v1001_v42 = vadd.f32 1.0, %v1629_v41  ;;  %v1631_v18 = vpop.eup %1630  ;;  %1508 = vmatpush3.msra.mxu0 %v31_v37 }
0x115e   :  { %v1002_v43 = vadd.f32 1.0, %v1631_v18  ;;  %1509 = vmatprep.subr.mxu0 %v1658_v1  ;;  %v28_v18 = vld [vmem:[%s2115_s1 + $0x58] sm:$0xff] }
0x115f   :  { %1632 = vrcp.f32 %v1001_v42  ;;  %1510 = vmatpush3.msra.mxu0 %v30_v40  ;;  %v29_v42 = vld [vmem:[%s2115_s1 + $0x60] sm:$0xff] }
0x1160   :  { %1634 = vrcp.f32 %v1002_v43  ;;  %1511 = vmatprep.subr.mxu0 %v1658_v1  ;;  %v27_v43 = vld [vmem:[%s2115_s1 + $0x50] sm:$0xff] }
0x1161   :  { %1512 = vmatpush3.msra.mxu0 %v29_v42 }
0x1162   :  { %1513 = vmatprep.subr.mxu0 %v1658_v1 }
0x1163   :  { %1514 = vmatpush3.msra.mxu0 %v28_v18 }
0x1164   :  { %1515 = vmatprep.subr.mxu0 %v1658_v1 }
0x1165   :  { %1516 = vmatpush3.msra.mxu0 %v27_v43 }
0x116c   :  { %v1633_v44 = vpop.eup %1632 }
0x116d   :  { %v1635_v46 = vpop.eup %1634  ;;  %v1009_v49 = vmul.f32 %v1633_v44, %v916_v61 }
0x116e   :  { %v1010_v51 = vmul.f32 %v1635_v46, %v917_v0 }
0x11ca   :  { %v1014_v14 = vpop.permute.xlu0 %1013 }
0x11cb   :  { %v1019_v45 = vmul.f32 %v1633_v44, %v1014_v14 }
0x11cd   :  { %1023 = vrot.lane.b32.xlu0 %v1019_v45, %s1661_s13 }
0x11ce   :  { %v1016_v47 = vpop.permute.xlu1 %1015 }
0x11cf   :  { %v1020_v48 = vmul.f32 %v1635_v46, %v1016_v47 }
0x11d1   :  { %1025 = vrot.lane.b32.xlu1 %v1020_v48, %s1661_s13 }
0x123f   :  { %v1024_v5 = vpop.permute.xlu0 %1023 }
0x1240   :  { %v1029_v50 = vadd.f32 %v1024_v5, %v1009_v49  ;;  %v1308_v5 = vld [vmem:[%s2115_s1 + $0x90] ss:$0 sm:$0xff] }
0x1242   :  { %1636 = vtanh.f32 %v1029_v50 }
0x1243   :  { %v1026_v52 = vpop.permute.xlu1 %1025 }
0x1244   :  { %v1030_v11 = vadd.f32 %v1026_v52, %v1010_v51 }
0x1246   :  { %1638 = vtanh.f32 %v1030_v11 }
0x124f   :  { %v1637_v15 = vpop.eup %1636 }
0x1250   :  { %1035 = vrot.lane.b32.xlu0 %v1637_v15, %s1661_s13 }
0x1253   :  { %v1639_v36 = vpop.eup %1638 }
0x1254   :  { %1037 = vrot.lane.b32.xlu1 %v1639_v36, %s1661_s13 }
0x12c2   :  { %v1036_v22 = vpop.permute.xlu0 %1035 }
0x12c3   :  { %v1041_v53 = vmul.f32 %v1633_v44, %v1036_v22 }
0x12c5   :  { %1045 = vrot.lane.b32.xlu0 %v1041_v53, %s1662_s18 }
0x12c6   :  { %v1038_v13 = vpop.permute.xlu1 %1037 }
0x12c7   :  { %v1042_v54 = vmul.f32 %v1635_v46, %v1038_v13  ;;  %v1245_v46 = vld [vmem:[%s2117_s2] sm:$0xff] }
0x12c9   :  { %1051 = vrot.lane.b32.xlu0 %v1041_v53, %s1663_s19  ;;  %1047 = vrot.lane.b32.xlu1 %v1042_v54, %s1662_s18 }
0x12cd   :  { %1053 = vrot.lane.b32.xlu1 %v1042_v54, %s1663_s19 }
0x1337   :  { %v1046_v39 = vpop.permute.xlu0 %1045 }
0x133b   :  { %v1052_v12 = vpop.permute.xlu0 %1051  ;;  %v1048_v55 = vpop.permute.xlu1 %1047 }
0x133c   :  { %v1057_v56 = vsel %vm378_vm8, %v1046_v39, %v1052_v12 }
0x133d   :  { %v1059_v59 = vmul.f32 %v1737_v16, %v1057_v56 }
0x133f   :  { %v1054_v57 = vpop.permute.xlu1 %1053 }
0x1340   :  { %v1058_v58 = vsel %vm378_vm8, %v1048_v55, %v1054_v57 }
0x1341   :  { %v1060_v60 = vmul.f32 %v1740_v17, %v1058_v58 }
0x1343   :  { %v1061_v61 = vpack.c.bf16 %v1060_v60, %v1059_v59 }
0x1345   :  { %1498 = vmatmul.mubr.msk.bf16.vlgmr.msra.gmra.mxu1 %vm269_vm7, %v1061_v61 }
0x1405   :  { %v1099_v62 = vpop.f32.mrf.mxu1 }
0x1406   :  { %v1106_v63 = vadd.f32 %v1099_v62, %v1916_v20 }
0x1407   :  { %v1499_v0 = vpop.f32.mrf.mxu1 }
0x1408   :  { %1640 = vtanh.f32 %v1106_v63  ;;  %v1306_v16 = vmul.f32 -1.442695, %v1106_v63 }
0x1409   :  { %v1102_v2 = vpop.f32.mrf.mxu1 }
0x140a   :  { %v1107_v3 = vadd.f32 %v1914_v19, %v1102_v2 }
0x140b   :  { %v1500_v10 = vpop.f32.mrf.mxu1 }
0x140c   :  { %1642 = vtanh.f32 %v1107_v3  ;;  %v1307_v17 = vmul.f32 -1.442695, %v1107_v3 }
0x140d   :  { %1644 = vpow2.f32 %v1306_v16 }
0x140e   :  { %1646 = vpow2.f32 %v1307_v17 }
0x1415   :  { %v1641_v4 = vpop.eup %1640 }
0x1416   :  { %1126 = vrot.lane.b32.xlu0 %v1641_v4, %s1661_s13 }
0x1419   :  { %v1643_v6 = vpop.eup %1642 }
0x141a   :  { %1128 = vrot.lane.b32.xlu1 %v1643_v6, %s1661_s13  ;;  %v1645_v9 = vpop.eup %1644 }
0x141b   :  { %v1114_v21 = vadd.f32 1.0, %v1645_v9  ;;  %v1647_v20 = vpop.eup %1646 }
0x141c   :  { %v1115_v23 = vadd.f32 1.0, %v1647_v20 }
0x141d   :  { %1648 = vrcp.f32 %v1114_v21 }
0x141e   :  { %1650 = vrcp.f32 %v1115_v23 }
0x142a   :  { %v1649_v24 = vpop.eup %1648 }
0x142b   :  { %v1651_v26 = vpop.eup %1650  ;;  %v1122_v28 = vmul.f32 %v1649_v24, %v1029_v50 }
0x142c   :  { %v1123_v30 = vmul.f32 %v1651_v26, %v1030_v11 }
0x1488   :  { %v1127_v19 = vpop.permute.xlu0 %1126 }
0x1489   :  { %v1132_v25 = vmul.f32 %v1649_v24, %v1127_v19 }
0x148b   :  { %1136 = vrot.lane.b32.xlu0 %v1132_v25, %s1661_s13 }
0x148c   :  { %v1129_v27 = vpop.permute.xlu1 %1128 }
0x148d   :  { %v1133_v8 = vmul.f32 %v1651_v26, %v1129_v27 }
0x148f   :  { %1138 = vrot.lane.b32.xlu1 %v1133_v8, %s1661_s13 }
0x14fd   :  { %v1137_v29 = vpop.permute.xlu0 %1136 }
0x14fe   :  { %v1142_v7 = vadd.f32 %v1137_v29, %v1122_v28 }
0x1500   :  { %1652 = vtanh.f32 %v1142_v7 }
0x1501   :  { %v1139_v31 = vpop.permute.xlu1 %1138 }
0x1502   :  { %v1143_v32 = vadd.f32 %v1139_v31, %v1123_v30 }
0x1504   :  { %1654 = vtanh.f32 %v1143_v32 }
0x150d   :  { %v1653_v38 = vpop.eup %1652 }
0x150e   :  { %1148 = vrot.lane.b32.xlu0 %v1653_v38, %s1661_s13 }
0x1511   :  { %v1655_v41 = vpop.eup %1654 }
0x1512   :  { %1150 = vrot.lane.b32.xlu1 %v1655_v41, %s1661_s13 }
0x1580   :  { %v1149_v44 = vpop.permute.xlu0 %1148 }
0x1581   :  { %v1154_v14 = vmul.f32 %v1649_v24, %v1149_v44 }
0x1583   :  { %1157 = vrot.lane.b32.xlu0 %v1154_v14, %s1662_s18 }
0x1584   :  { %v1151_v45 = vpop.permute.xlu1 %1150 }
0x1585   :  { %v1155_v47 = vmul.f32 %v1651_v26, %v1151_v45 }
0x1587   :  { %1161 = vrot.lane.b32.xlu1 %v1155_v47, %s1663_s19  ;;  %1247 = vrot.lane.b32.xlu0 %v1245_v46, %s1664_s11  ;;  %s1665_s19 = smov 112  }
0x15f5   :  { %v1158_v1 = vpop.permute.xlu0 %1157 }
0x15f9   :  { %v1162_v48 = vpop.permute.xlu1 %1161  ;;  %v1248_v36 = vpop.permute.xlu0 %1247 }
0x15fa   :  { %v1164_v49 = vsel %vm378_vm8, %v1158_v1, %v1162_v48 }
0x15fb   :  { %1518 = vmatmul.mubr.msk.f32.vlgmr.msra.gmra.mxu0 %vm269_vm7, %v1164_v49 }
0x16bb   :  { %v1238_v50 = vpop.f32.mrf.mxu0 }
0x16bc   :  { %v1239_v51 = vadd.f32 %v1308_v5, %v1238_v50 }
0x16bd   :  { %v1519_v52 = vpop.f32.mrf.mxu0 }
0x16be   :  { %v1242_v11 = vmul.f32 0.5, %v1239_v51  ;;  %1257 = vst.msk [vmem:[%s2118_s4] sm:$0xff] %vm378_vm8, %v1239_v51 }
0x16c0   :  { %v1243_v15 = vmul.f32 1.442695, %v1242_v11 }
0x16c2   :  { %1656 = vpow2.f32 %v1243_v15 }
0x16cf   :  { %v1657_v22 = vpop.eup %1656 }
0x16d0   :  { %v1250_v53 = vmul.f32 %v1657_v22, %v1248_v36 }
0x16d2   :  { %1252 = vrot.lane.b32.xlu1 %v1250_v53, %s1665_s19 }
0x1744   :  { %v1253_v13 = vpop.permute.xlu1 %1252 }
0x1745   :  { %v1255_v54 = vadd.f32 %v1253_v13, %v1239_v51 }
0x1747   :  { %1256 = vst.msk [vmem:[%s2119_s3] sm:$0xff] %vm52_vm1, %v1255_v54 }

</bundles_post_ra>
